<compile_context>
chip_gen: v6e
topology: v6e:2x2x1
jax: 0.10.0
libtpu: 0.0.40
codegen_flags: <defaults>
</compile_context>

<pallas_src>
import functools

import jax
import jax.numpy as jnp
from jax.experimental import pallas as pl
from jax.experimental.pallas import tpu as pltpu

_EPS = 1e-5


def _block_kernel(x_ref, mask_ref, w1_ref, w2_ref, g1_ref, b1_ref,
                  g2_ref, b2_ref, out_ref, stack_ref, *,
                  cin, shifts, count, mxu_dtype):
    """conv3x3 -> BN -> ReLU -> conv3x3 -> BN -> add(identity) -> ReLU.

    Layout: (C, L) with C on sublanes and the flattened zero-padded spatial
    slab (length L, multiple of 128) on lanes.  Halo and lane-pad columns of
    `x` are zero; `mask` is 1.0 exactly at the `count` real output pixels.
    """
    x = x_ref[...]                      # (C, L) f32
    mask = mask_ref[...]                # (1, L) f32
    lanes = x.shape[1]
    inv_cnt = 1.0 / count
    prec = jax.lax.Precision.HIGHEST if mxu_dtype == jnp.float32 else None

    def conv3x3(slab, w_ref):
        # Build the stacked (9*Cin, L) operand: one constant lane-shift per tap
        # (taps of valid output pixels never wrap thanks to the padded layout;
        # wrapped values only land on halo/pad columns, which are masked/dropped).
        # Then a single K=9*Cin MXU matmul -> (Cout, L) f32 accumulate.
        for t, s in enumerate(shifts):
            if s == 0:
                shifted = slab
            else:
                shifted = pltpu.roll(slab, shift=(-s) % lanes, axis=1)
            stack_ref[t * cin:(t + 1) * cin, :] = shifted.astype(mxu_dtype)
        return jnp.dot(w_ref[...], stack_ref[...],
                       preferred_element_type=jnp.float32, precision=prec)

    def batchnorm(h, g_ref, b_ref):
        # training-mode BatchNorm2d: batch mean / biased var over the real pixels
        mu = jnp.sum(h * mask, axis=1, keepdims=True) * inv_cnt       # (C, 1)
        cen = (h - mu) * mask
        var = jnp.sum(cen * cen, axis=1, keepdims=True) * inv_cnt     # (C, 1)
        return g_ref[...] * (h - mu) * jax.lax.rsqrt(var + _EPS) + b_ref[...]

    # conv1 -> bn1 -> relu; re-zero halo/pad columns before conv2 consumes it.
    y1 = jnp.maximum(batchnorm(conv3x3(x, w1_ref), g1_ref, b1_ref), 0.0) * mask
    # conv2 -> bn2 -> identity residual -> relu (halo/pad garbage dropped by wrapper).
    y2 = batchnorm(conv3x3(y1, w2_ref), g2_ref, b2_ref)
    out_ref[...] = jnp.maximum(y2 + x, 0.0)


def resnet_basicblock(x_nchw, w1, g1, b1, w2, g2, b2, *, mxu_dtype=jnp.bfloat16):
    """x_nchw: (N, C, H, W) f32; conv weights in PyTorch OIHW layout."""
    N, C, H, W = x_nchw.shape
    Hp, Wp = H + 2, W + 2
    Mp = N * Hp * Wp                      # zero-padded spatial slab length
    L = pl.cdiv(Mp, 128) * 128            # lane-dense length (multiple of 128)

    # glue: NCHW -> channels-on-sublane, padded-spatial-on-lane slab (C, L)
    x_pad = jnp.pad(x_nchw, ((0, 0), (0, 0), (1, 1), (1, 1)))
    x_slab = jnp.transpose(x_pad, (1, 0, 2, 3)).reshape(C, Mp)
    x_slab = jnp.pad(x_slab, ((0, 0), (0, L - Mp)))

    # interior mask: 1.0 exactly at the N*H*W real pixels (excludes halo + lane pad)
    ii = jnp.tile(jnp.repeat(jnp.arange(Hp), Wp), N)
    jj = jnp.tile(jnp.arange(Wp), N * Hp)
    interior = ((ii >= 1) & (ii <= H) & (jj >= 1) & (jj <= W)).astype(jnp.float32)
    mask = jnp.pad(interior, (0, L - Mp)).reshape(1, L)

    # weights (Cout, Cin, 3, 3) -> (Cout, 9*Cin); column index = t*Cin + cin, t = ky*3+kx
    to_stack = lambda w: jnp.transpose(w, (0, 2, 3, 1)).reshape(C, 9 * C).astype(mxu_dtype)
    w1_s, w2_s = to_stack(w1), to_stack(w2)

    # per-tap constant lane offsets in the padded layout, t = ky*3 + kx
    shifts = tuple((ky - 1) * Wp + (kx - 1) for ky in range(3) for kx in range(3))

    kernel = functools.partial(_block_kernel, cin=C, shifts=shifts,
                               count=float(N * H * W), mxu_dtype=mxu_dtype)
    vmem = pl.BlockSpec(memory_space=pltpu.MemorySpace.VMEM)
    out_slab = pl.pallas_call(
        kernel,
        out_shape=jax.ShapeDtypeStruct((C, L), jnp.float32),
        in_specs=[vmem] * 8,
        out_specs=vmem,
        scratch_shapes=[pltpu.VMEM((9 * C, L), mxu_dtype)],   # stacked conv operand
        compiler_params=pltpu.CompilerParams(vmem_limit_bytes=32 * 1024 * 1024),
    )(x_slab, mask, w1_s, w2_s,
      g1.reshape(C, 1), b1.reshape(C, 1), g2.reshape(C, 1), b2.reshape(C, 1))

    # glue: back to NCHW, drop halo and lane padding
    out = out_slab[:, :Mp].reshape(C, N, Hp, Wp)
    return jnp.transpose(out, (1, 0, 2, 3))[:, :, 1:H + 1, 1:W + 1]


def _reference(x, w1, g1, b1, w2, g2, b2):
    """Pure-JAX reference with the same (training-mode BN) semantics."""
    conv = lambda a, w: jax.lax.conv_general_dilated(
        a, w, window_strides=(1, 1), padding=((1, 1), (1, 1)),
        dimension_numbers=("NCHW", "OIHW", "NCHW"),
        precision=jax.lax.Precision.HIGHEST)

    def bn(a, g, b):
        mu = a.mean(axis=(0, 2, 3), keepdims=True)
        var = ((a - mu) ** 2).mean(axis=(0, 2, 3), keepdims=True)
        return (g[None, :, None, None] * (a - mu) * jax.lax.rsqrt(var + _EPS)
                + b[None, :, None, None])

    out = jax.nn.relu(bn(conv(x, w1), g1, b1))
    out = bn(conv(out, w2), g2, b2)
    return jax.nn.relu(out + x)


if __name__ == "__main__":
    # small shapes: batch=2, inplanes=planes=16 (CifarResNet stage-1), spatial=16x16
    N, C, H, W = 2, 16, 16, 16
    keys = jax.random.split(jax.random.PRNGKey(0), 7)
    x = jax.random.normal(keys[0], (N, C, H, W), jnp.float32)
    w1 = 0.2 * jax.random.normal(keys[1], (C, C, 3, 3), jnp.float32)
    w2 = 0.2 * jax.random.normal(keys[2], (C, C, 3, 3), jnp.float32)
    g1 = 1.0 + 0.1 * jax.random.normal(keys[3], (C,), jnp.float32)
    b1 = 0.1 * jax.random.normal(keys[4], (C,), jnp.float32)
    g2 = 1.0 + 0.1 * jax.random.normal(keys[5], (C,), jnp.float32)
    b2 = 0.1 * jax.random.normal(keys[6], (C,), jnp.float32)

    out = jax.jit(resnet_basicblock)(x, w1, g1, b1, w2, g2, b2)
    out = jax.block_until_ready(out)

    ref = _reference(x, w1, g1, b1, w2, g2, b2)
    err = float(jnp.max(jnp.abs(out - ref)))
    # Tolerance sized for bf16 MXU operands (perf feedback for v6e/v7x) across two
    # chained convs + BNs; mxu_dtype=jnp.float32 reproduces the reference to ~1e-5.
    assert out.shape == (N, C, H, W) and err < 5e-2, f"max abs err {err}"
    print("KERNEL_OK")
</pallas_src>

<mosaic_0001>
module attributes {stable_mosaic.version = 11 : i64} {
  func.func @_block_kernel(%arg0: memref<16x768xf32, #tpu.memory_space<vmem>>, %arg1: memref<1x768xf32, #tpu.memory_space<vmem>>, %arg2: memref<16x144xbf16, #tpu.memory_space<vmem>>, %arg3: memref<16x144xbf16, #tpu.memory_space<vmem>>, %arg4: memref<16x1xf32, #tpu.memory_space<vmem>>, %arg5: memref<16x1xf32, #tpu.memory_space<vmem>>, %arg6: memref<16x1xf32, #tpu.memory_space<vmem>>, %arg7: memref<16x1xf32, #tpu.memory_space<vmem>>, %arg8: memref<16x768xf32, #tpu.memory_space<vmem>>, %arg9: memref<144x768xbf16, #tpu.memory_space<vmem>>) attributes {dimension_semantics = [], scalar_prefetch = 0 : i64, scratch_operands = 1 : i64, tpu.core_type = #tpu.core_type<tc>} {
    %c0 = arith.constant 0 : index
    %c0_0 = arith.constant 0 : index
    %0 = vector.load %arg0[%c0, %c0_0] : memref<16x768xf32, #tpu.memory_space<vmem>>, vector<16x768xf32>
    %c0_1 = arith.constant 0 : index
    %c0_2 = arith.constant 0 : index
    %1 = vector.load %arg1[%c0_1, %c0_2] : memref<1x768xf32, #tpu.memory_space<vmem>>, vector<1x768xf32>
    %c19_i32 = arith.constant 19 : i32
    %2 = tpu.dynamic_rotate %0 by %c19_i32 dim 1 : vector<16x768xf32>, i32 -> vector<16x768xf32>
    %3 = arith.truncf %2 : vector<16x768xf32> to vector<16x768xbf16>
    %c0_3 = arith.constant 0 : index
    %c0_4 = arith.constant 0 : index
    %4 = vector.load %arg9[%c0_3, %c0_4] : memref<144x768xbf16, #tpu.memory_space<vmem>>, vector<16x768xbf16>
    tpu.vector_store %arg9[%c0_3, %c0_4], %3 {strides = array<i32>} : memref<144x768xbf16, #tpu.memory_space<vmem>>, vector<16x768xbf16>,
    %c18_i32 = arith.constant 18 : i32
    %5 = tpu.dynamic_rotate %0 by %c18_i32 dim 1 : vector<16x768xf32>, i32 -> vector<16x768xf32>
    %6 = arith.truncf %5 : vector<16x768xf32> to vector<16x768xbf16>
    %c16 = arith.constant 16 : index
    %c0_5 = arith.constant 0 : index
    %7 = vector.load %arg9[%c16, %c0_5] : memref<144x768xbf16, #tpu.memory_space<vmem>>, vector<16x768xbf16>
    tpu.vector_store %arg9[%c16, %c0_5], %6 {strides = array<i32>} : memref<144x768xbf16, #tpu.memory_space<vmem>>, vector<16x768xbf16>,
    %c17_i32 = arith.constant 17 : i32
    %8 = tpu.dynamic_rotate %0 by %c17_i32 dim 1 : vector<16x768xf32>, i32 -> vector<16x768xf32>
    %9 = arith.truncf %8 : vector<16x768xf32> to vector<16x768xbf16>
    %c32 = arith.constant 32 : index
    %c0_6 = arith.constant 0 : index
    %10 = vector.load %arg9[%c32, %c0_6] : memref<144x768xbf16, #tpu.memory_space<vmem>>, vector<16x768xbf16>
    tpu.vector_store %arg9[%c32, %c0_6], %9 {strides = array<i32>} : memref<144x768xbf16, #tpu.memory_space<vmem>>, vector<16x768xbf16>,
    %c1_i32 = arith.constant 1 : i32
    %11 = tpu.dynamic_rotate %0 by %c1_i32 dim 1 : vector<16x768xf32>, i32 -> vector<16x768xf32>
    %12 = arith.truncf %11 : vector<16x768xf32> to vector<16x768xbf16>
    %c48 = arith.constant 48 : index
    %c0_7 = arith.constant 0 : index
    %13 = vector.load %arg9[%c48, %c0_7] : memref<144x768xbf16, #tpu.memory_space<vmem>>, vector<16x768xbf16>
    tpu.vector_store %arg9[%c48, %c0_7], %12 {strides = array<i32>} : memref<144x768xbf16, #tpu.memory_space<vmem>>, vector<16x768xbf16>,
    %14 = arith.truncf %0 : vector<16x768xf32> to vector<16x768xbf16>
    %c64 = arith.constant 64 : index
    %c0_8 = arith.constant 0 : index
    %15 = vector.load %arg9[%c64, %c0_8] : memref<144x768xbf16, #tpu.memory_space<vmem>>, vector<16x768xbf16>
    tpu.vector_store %arg9[%c64, %c0_8], %14 {strides = array<i32>} : memref<144x768xbf16, #tpu.memory_space<vmem>>, vector<16x768xbf16>,
    %c767_i32 = arith.constant 767 : i32
    %16 = tpu.dynamic_rotate %0 by %c767_i32 dim 1 : vector<16x768xf32>, i32 -> vector<16x768xf32>
    %17 = arith.truncf %16 : vector<16x768xf32> to vector<16x768xbf16>
    %c80 = arith.constant 80 : index
    %c0_9 = arith.constant 0 : index
    %18 = vector.load %arg9[%c80, %c0_9] : memref<144x768xbf16, #tpu.memory_space<vmem>>, vector<16x768xbf16>
    tpu.vector_store %arg9[%c80, %c0_9], %17 {strides = array<i32>} : memref<144x768xbf16, #tpu.memory_space<vmem>>, vector<16x768xbf16>,
    %c751_i32 = arith.constant 751 : i32
    %19 = tpu.dynamic_rotate %0 by %c751_i32 dim 1 : vector<16x768xf32>, i32 -> vector<16x768xf32>
    %20 = arith.truncf %19 : vector<16x768xf32> to vector<16x768xbf16>
    %c96 = arith.constant 96 : index
    %c0_10 = arith.constant 0 : index
    %21 = vector.load %arg9[%c96, %c0_10] : memref<144x768xbf16, #tpu.memory_space<vmem>>, vector<16x768xbf16>
    tpu.vector_store %arg9[%c96, %c0_10], %20 {strides = array<i32>} : memref<144x768xbf16, #tpu.memory_space<vmem>>, vector<16x768xbf16>,
    %c750_i32 = arith.constant 750 : i32
    %22 = tpu.dynamic_rotate %0 by %c750_i32 dim 1 : vector<16x768xf32>, i32 -> vector<16x768xf32>
    %23 = arith.truncf %22 : vector<16x768xf32> to vector<16x768xbf16>
    %c112 = arith.constant 112 : index
    %c0_11 = arith.constant 0 : index
    %24 = vector.load %arg9[%c112, %c0_11] : memref<144x768xbf16, #tpu.memory_space<vmem>>, vector<16x768xbf16>
    tpu.vector_store %arg9[%c112, %c0_11], %23 {strides = array<i32>} : memref<144x768xbf16, #tpu.memory_space<vmem>>, vector<16x768xbf16>,
    %c749_i32 = arith.constant 749 : i32
    %25 = tpu.dynamic_rotate %0 by %c749_i32 dim 1 : vector<16x768xf32>, i32 -> vector<16x768xf32>
    %26 = arith.truncf %25 : vector<16x768xf32> to vector<16x768xbf16>
    %c128 = arith.constant 128 : index
    %c0_12 = arith.constant 0 : index
    %27 = vector.load %arg9[%c128, %c0_12] : memref<144x768xbf16, #tpu.memory_space<vmem>>, vector<16x768xbf16>
    tpu.vector_store %arg9[%c128, %c0_12], %26 {strides = array<i32>} : memref<144x768xbf16, #tpu.memory_space<vmem>>, vector<16x768xbf16>,
    %c0_13 = arith.constant 0 : index
    %c0_14 = arith.constant 0 : index
    %28 = vector.load %arg2[%c0_13, %c0_14] : memref<16x144xbf16, #tpu.memory_space<vmem>>, vector<16x144xbf16>
    %c0_15 = arith.constant 0 : index
    %c0_16 = arith.constant 0 : index
    %29 = vector.load %arg9[%c0_15, %c0_16] : memref<144x768xbf16, #tpu.memory_space<vmem>>, vector<144x768xbf16>
    %cst = arith.constant dense<0.000000e+00> : vector<16x768xf32>
    %30 = tpu.matmul %28, %29, %cst {dimension_numbers = #tpu.dot_dimension_numbers<[1], [0], [0], [1], [0, 0, 1, 1], [], []>} : vector<16x144xbf16>, vector<144x768xbf16>, vector<16x768xf32> -> vector<16x768xf32>
    %31 = vector.broadcast %1 : vector<1x768xf32> to vector<16x768xf32>
    %32 = arith.mulf %30, %31 : vector<16x768xf32>
    %cst_17 = arith.constant dense<0.000000e+00> : vector<16xf32>
    %33 = vector.multi_reduction <add>, %32, %cst_17 [1] : vector<16x768xf32> to vector<16xf32>
    %34 = vector.shape_cast %33 : vector<16xf32> to vector<16x1xf32>
    %cst_18 = arith.constant 0.001953125 : f32
    %35 = vector.broadcast %cst_18 : f32 to vector<16x1xf32>
    %36 = arith.mulf %34, %35 : vector<16x1xf32>
    %37 = vector.broadcast %36 : vector<16x1xf32> to vector<16x768xf32>
    %38 = arith.subf %30, %37 : vector<16x768xf32>
    %39 = vector.broadcast %1 : vector<1x768xf32> to vector<16x768xf32>
    %40 = arith.mulf %38, %39 : vector<16x768xf32>
    %41 = arith.mulf %40, %40 : vector<16x768xf32>
    %cst_19 = arith.constant dense<0.000000e+00> : vector<16xf32>
    %42 = vector.multi_reduction <add>, %41, %cst_19 [1] : vector<16x768xf32> to vector<16xf32>
    %43 = vector.shape_cast %42 : vector<16xf32> to vector<16x1xf32>
    %cst_20 = arith.constant 0.001953125 : f32
    %44 = vector.broadcast %cst_20 : f32 to vector<16x1xf32>
    %45 = arith.mulf %43, %44 : vector<16x1xf32>
    %c0_21 = arith.constant 0 : index
    %c0_22 = arith.constant 0 : index
    %46 = vector.load %arg4[%c0_21, %c0_22] : memref<16x1xf32, #tpu.memory_space<vmem>>, vector<16x1xf32>
    %47 = vector.broadcast %36 : vector<16x1xf32> to vector<16x768xf32>
    %48 = arith.subf %30, %47 : vector<16x768xf32>
    %49 = vector.broadcast %46 : vector<16x1xf32> to vector<16x768xf32>
    %50 = arith.mulf %49, %48 : vector<16x768xf32>
    %cst_23 = arith.constant 9.99999974E-6 : f32
    %51 = vector.broadcast %cst_23 : f32 to vector<16x1xf32>
    %52 = arith.addf %45, %51 : vector<16x1xf32>
    %53 = math.rsqrt %52 : vector<16x1xf32>
    %54 = vector.broadcast %53 : vector<16x1xf32> to vector<16x768xf32>
    %55 = arith.mulf %50, %54 : vector<16x768xf32>
    %c0_24 = arith.constant 0 : index
    %c0_25 = arith.constant 0 : index
    %56 = vector.load %arg5[%c0_24, %c0_25] : memref<16x1xf32, #tpu.memory_space<vmem>>, vector<16x1xf32>
    %57 = vector.broadcast %56 : vector<16x1xf32> to vector<16x768xf32>
    %58 = arith.addf %55, %57 : vector<16x768xf32>
    %cst_26 = arith.constant 0.000000e+00 : f32
    %59 = vector.broadcast %cst_26 : f32 to vector<16x768xf32>
    %60 = arith.maximumf %58, %59 : vector<16x768xf32>
    %61 = vector.broadcast %1 : vector<1x768xf32> to vector<16x768xf32>
    %62 = arith.mulf %60, %61 : vector<16x768xf32>
    %c19_i32_27 = arith.constant 19 : i32
    %63 = tpu.dynamic_rotate %62 by %c19_i32_27 dim 1 : vector<16x768xf32>, i32 -> vector<16x768xf32>
    %64 = arith.truncf %63 : vector<16x768xf32> to vector<16x768xbf16>
    %c0_28 = arith.constant 0 : index
    %c0_29 = arith.constant 0 : index
    %65 = vector.load %arg9[%c0_28, %c0_29] : memref<144x768xbf16, #tpu.memory_space<vmem>>, vector<16x768xbf16>
    tpu.vector_store %arg9[%c0_28, %c0_29], %64 {strides = array<i32>} : memref<144x768xbf16, #tpu.memory_space<vmem>>, vector<16x768xbf16>,
    %c18_i32_30 = arith.constant 18 : i32
    %66 = tpu.dynamic_rotate %62 by %c18_i32_30 dim 1 : vector<16x768xf32>, i32 -> vector<16x768xf32>
    %67 = arith.truncf %66 : vector<16x768xf32> to vector<16x768xbf16>
    %c16_31 = arith.constant 16 : index
    %c0_32 = arith.constant 0 : index
    %68 = vector.load %arg9[%c16_31, %c0_32] : memref<144x768xbf16, #tpu.memory_space<vmem>>, vector<16x768xbf16>
    tpu.vector_store %arg9[%c16_31, %c0_32], %67 {strides = array<i32>} : memref<144x768xbf16, #tpu.memory_space<vmem>>, vector<16x768xbf16>,
    %c17_i32_33 = arith.constant 17 : i32
    %69 = tpu.dynamic_rotate %62 by %c17_i32_33 dim 1 : vector<16x768xf32>, i32 -> vector<16x768xf32>
    %70 = arith.truncf %69 : vector<16x768xf32> to vector<16x768xbf16>
    %c32_34 = arith.constant 32 : index
    %c0_35 = arith.constant 0 : index
    %71 = vector.load %arg9[%c32_34, %c0_35] : memref<144x768xbf16, #tpu.memory_space<vmem>>, vector<16x768xbf16>
    tpu.vector_store %arg9[%c32_34, %c0_35], %70 {strides = array<i32>} : memref<144x768xbf16, #tpu.memory_space<vmem>>, vector<16x768xbf16>,
    %c1_i32_36 = arith.constant 1 : i32
    %72 = tpu.dynamic_rotate %62 by %c1_i32_36 dim 1 : vector<16x768xf32>, i32 -> vector<16x768xf32>
    %73 = arith.truncf %72 : vector<16x768xf32> to vector<16x768xbf16>
    %c48_37 = arith.constant 48 : index
    %c0_38 = arith.constant 0 : index
    %74 = vector.load %arg9[%c48_37, %c0_38] : memref<144x768xbf16, #tpu.memory_space<vmem>>, vector<16x768xbf16>
    tpu.vector_store %arg9[%c48_37, %c0_38], %73 {strides = array<i32>} : memref<144x768xbf16, #tpu.memory_space<vmem>>, vector<16x768xbf16>,
    %75 = arith.truncf %62 : vector<16x768xf32> to vector<16x768xbf16>
    %c64_39 = arith.constant 64 : index
    %c0_40 = arith.constant 0 : index
    %76 = vector.load %arg9[%c64_39, %c0_40] : memref<144x768xbf16, #tpu.memory_space<vmem>>, vector<16x768xbf16>
    tpu.vector_store %arg9[%c64_39, %c0_40], %75 {strides = array<i32>} : memref<144x768xbf16, #tpu.memory_space<vmem>>, vector<16x768xbf16>,
    %c767_i32_41 = arith.constant 767 : i32
    %77 = tpu.dynamic_rotate %62 by %c767_i32_41 dim 1 : vector<16x768xf32>, i32 -> vector<16x768xf32>
    %78 = arith.truncf %77 : vector<16x768xf32> to vector<16x768xbf16>
    %c80_42 = arith.constant 80 : index
    %c0_43 = arith.constant 0 : index
    %79 = vector.load %arg9[%c80_42, %c0_43] : memref<144x768xbf16, #tpu.memory_space<vmem>>, vector<16x768xbf16>
    tpu.vector_store %arg9[%c80_42, %c0_43], %78 {strides = array<i32>} : memref<144x768xbf16, #tpu.memory_space<vmem>>, vector<16x768xbf16>,
    %c751_i32_44 = arith.constant 751 : i32
    %80 = tpu.dynamic_rotate %62 by %c751_i32_44 dim 1 : vector<16x768xf32>, i32 -> vector<16x768xf32>
    %81 = arith.truncf %80 : vector<16x768xf32> to vector<16x768xbf16>
    %c96_45 = arith.constant 96 : index
    %c0_46 = arith.constant 0 : index
    %82 = vector.load %arg9[%c96_45, %c0_46] : memref<144x768xbf16, #tpu.memory_space<vmem>>, vector<16x768xbf16>
    tpu.vector_store %arg9[%c96_45, %c0_46], %81 {strides = array<i32>} : memref<144x768xbf16, #tpu.memory_space<vmem>>, vector<16x768xbf16>,
    %c750_i32_47 = arith.constant 750 : i32
    %83 = tpu.dynamic_rotate %62 by %c750_i32_47 dim 1 : vector<16x768xf32>, i32 -> vector<16x768xf32>
    %84 = arith.truncf %83 : vector<16x768xf32> to vector<16x768xbf16>
    %c112_48 = arith.constant 112 : index
    %c0_49 = arith.constant 0 : index
    %85 = vector.load %arg9[%c112_48, %c0_49] : memref<144x768xbf16, #tpu.memory_space<vmem>>, vector<16x768xbf16>
    tpu.vector_store %arg9[%c112_48, %c0_49], %84 {strides = array<i32>} : memref<144x768xbf16, #tpu.memory_space<vmem>>, vector<16x768xbf16>,
    %c749_i32_50 = arith.constant 749 : i32
    %86 = tpu.dynamic_rotate %62 by %c749_i32_50 dim 1 : vector<16x768xf32>, i32 -> vector<16x768xf32>
    %87 = arith.truncf %86 : vector<16x768xf32> to vector<16x768xbf16>
    %c128_51 = arith.constant 128 : index
    %c0_52 = arith.constant 0 : index
    %88 = vector.load %arg9[%c128_51, %c0_52] : memref<144x768xbf16, #tpu.memory_space<vmem>>, vector<16x768xbf16>
    tpu.vector_store %arg9[%c128_51, %c0_52], %87 {strides = array<i32>} : memref<144x768xbf16, #tpu.memory_space<vmem>>, vector<16x768xbf16>,
    %c0_53 = arith.constant 0 : index
    %c0_54 = arith.constant 0 : index
    %89 = vector.load %arg3[%c0_53, %c0_54] : memref<16x144xbf16, #tpu.memory_space<vmem>>, vector<16x144xbf16>
    %c0_55 = arith.constant 0 : index
    %c0_56 = arith.constant 0 : index
    %90 = vector.load %arg9[%c0_55, %c0_56] : memref<144x768xbf16, #tpu.memory_space<vmem>>, vector<144x768xbf16>
    %cst_57 = arith.constant dense<0.000000e+00> : vector<16x768xf32>
    %91 = tpu.matmul %89, %90, %cst_57 {dimension_numbers = #tpu.dot_dimension_numbers<[1], [0], [0], [1], [0, 0, 1, 1], [], []>} : vector<16x144xbf16>, vector<144x768xbf16>, vector<16x768xf32> -> vector<16x768xf32>
    %92 = vector.broadcast %1 : vector<1x768xf32> to vector<16x768xf32>
    %93 = arith.mulf %91, %92 : vector<16x768xf32>
    %cst_58 = arith.constant dense<0.000000e+00> : vector<16xf32>
    %94 = vector.multi_reduction <add>, %93, %cst_58 [1] : vector<16x768xf32> to vector<16xf32>
    %95 = vector.shape_cast %94 : vector<16xf32> to vector<16x1xf32>
    %cst_59 = arith.constant 0.001953125 : f32
    %96 = vector.broadcast %cst_59 : f32 to vector<16x1xf32>
    %97 = arith.mulf %95, %96 : vector<16x1xf32>
    %98 = vector.broadcast %97 : vector<16x1xf32> to vector<16x768xf32>
    %99 = arith.subf %91, %98 : vector<16x768xf32>
    %100 = vector.broadcast %1 : vector<1x768xf32> to vector<16x768xf32>
    %101 = arith.mulf %99, %100 : vector<16x768xf32>
    %102 = arith.mulf %101, %101 : vector<16x768xf32>
    %cst_60 = arith.constant dense<0.000000e+00> : vector<16xf32>
    %103 = vector.multi_reduction <add>, %102, %cst_60 [1] : vector<16x768xf32> to vector<16xf32>
    %104 = vector.shape_cast %103 : vector<16xf32> to vector<16x1xf32>
    %cst_61 = arith.constant 0.001953125 : f32
    %105 = vector.broadcast %cst_61 : f32 to vector<16x1xf32>
    %106 = arith.mulf %104, %105 : vector<16x1xf32>
    %c0_62 = arith.constant 0 : index
    %c0_63 = arith.constant 0 : index
    %107 = vector.load %arg6[%c0_62, %c0_63] : memref<16x1xf32, #tpu.memory_space<vmem>>, vector<16x1xf32>
    %108 = vector.broadcast %97 : vector<16x1xf32> to vector<16x768xf32>
    %109 = arith.subf %91, %108 : vector<16x768xf32>
    %110 = vector.broadcast %107 : vector<16x1xf32> to vector<16x768xf32>
    %111 = arith.mulf %110, %109 : vector<16x768xf32>
    %cst_64 = arith.constant 9.99999974E-6 : f32
    %112 = vector.broadcast %cst_64 : f32 to vector<16x1xf32>
    %113 = arith.addf %106, %112 : vector<16x1xf32>
    %114 = math.rsqrt %113 : vector<16x1xf32>
    %115 = vector.broadcast %114 : vector<16x1xf32> to vector<16x768xf32>
    %116 = arith.mulf %111, %115 : vector<16x768xf32>
    %c0_65 = arith.constant 0 : index
    %c0_66 = arith.constant 0 : index
    %117 = vector.load %arg7[%c0_65, %c0_66] : memref<16x1xf32, #tpu.memory_space<vmem>>, vector<16x1xf32>
    %118 = vector.broadcast %117 : vector<16x1xf32> to vector<16x768xf32>
    %119 = arith.addf %116, %118 : vector<16x768xf32>
    %120 = arith.addf %119, %0 : vector<16x768xf32>
    %cst_67 = arith.constant 0.000000e+00 : f32
    %121 = vector.broadcast %cst_67 : f32 to vector<16x768xf32>
    %122 = arith.maximumf %120, %121 : vector<16x768xf32>
    %c0_68 = arith.constant 0 : index
    %c0_69 = arith.constant 0 : index
    %123 = vector.load %arg8[%c0_68, %c0_69] : memref<16x768xf32, #tpu.memory_space<vmem>>, vector<16x768xf32>
    tpu.vector_store %arg8[%c0_68, %c0_69], %122 {strides = array<i32>} : memref<16x768xf32, #tpu.memory_space<vmem>>, vector<16x768xf32>,
    return
  }
}

</mosaic_0001>

<bundles_post_ra>
// kernel: resnet_basicblock.1
= control target key start
LH: loop header
LB: loop body
LE: loop exit
PB: predicated region body
PF: predicated region fallthrough
CT: control target
= control target key end

     0   :  { %s3662_s17 = smov 110   ;;  %s3663_s18 = smov 111   ;;  %vm1054_vm0 = vcmask 130048   ;;  %v5046_v19 = vlaneseq  ;;  %s5037_s0 = inlined_call_operand.vmem [shape: f32[16,768], index: 0, kind: input, shape index: {}]   ;;  %s5038_s2 = inlined_call_operand.vmem [shape: bf16[16,144], index: 2, kind: input, shape index: {}]   ;;  %s5039_s1 = inlined_call_operand.vmem [shape: f32[1,768], index: 1, kind: input, shape index: {}]   ;;  %s5040_s4 = inlined_call_operand.vmem [shape: f32[16,1], index: 4, kind: input, shape index: {}]   ;;  %s5041_s5 = inlined_call_operand.vmem [shape: f32[16,1], index: 5, kind: input, shape index: {}]   ;;  %s5042_s3 = inlined_call_operand.vmem [shape: bf16[16,144], index: 3, kind: input, shape index: {}]   ;;  %s5043_s6 = inlined_call_operand.vmem [shape: f32[16,1], index: 6, kind: input, shape index: {}]   ;;  %s5044_s7 = inlined_call_operand.vmem [shape: f32[16,1], index: 7, kind: input, shape index: {}]   ;;  %s5045_s8 = inlined_call_operand.vmem [shape: f32[16,768], index: 8, kind: output, shape index: {}]  }
   0x1   :  { %v3719_v0 = vld [vmem:[%s5037_s0 + $0x8] sm:$0xff]  ;;  %v3724_v1 = vld [vmem:[%s5037_s0 + $0x38] sm:$0xff]  ;;  %v3729_v2 = vld [vmem:[%s5037_s0] sm:$0xff]  ;;  %s3664_s19 = smov 127   ;;  %s3665_s24 = smov 1  }
   0x2   :  { %v3154_v3 = vpack.i.bf16 %v3724_v1, %v3719_v0  ;;  %v3736_v4 = vld [vmem:[%s5037_s0 + $0x30] sm:$0xff]  ;;  %v3746_v6 = vld [vmem:[%s5037_s0 + $0x40] sm:$0xff]  ;;  %v3763_v9 = vld [vmem:[%s5037_s0 + $0x28] sm:$0xff]  ;;  %s3666_s25 = smov 17   ;;  %s3667_s26 = smov 18   ;;  %v3846_v20 = vand.u32 127, %v5046_v19 }
   0x3   :  { %v3741_v5 = vld [vmem:[%s5037_s0 + $0x10] sm:$0xff]  ;;  %v3164_v7 = vpack.i.bf16 %v3736_v4, %v3729_v2  ;;  %v3768_v10 = vld [vmem:[%s5037_s0 + $0x58] sm:$0xff]  ;;  %v3790_v13 = vld [vmem:[%s5037_s0 + $0x48] sm:$0xff]  ;;  %s3668_s9 = smov 19   ;;  %s3669_s14 = smov 109  }
   0x4   :  { %3155 = vrot.lane.b32.xlu0 %v3154_v3, %s3662_s17  ;;  %v3159_v8 = vpack.i.bf16 %v3746_v6, %v3741_v5  ;;  %v3209_v11 = vpack.i.bf16 %v3768_v10, %v3763_v9  ;;  %v3785_v12 = vld [vmem:[%s5037_s0 + $0x18] sm:$0xff]  ;;  %v3799_v15 = vld [vmem:[%s5037_s0 + $0x20] sm:$0xff]  ;;  %v3804_v16 = vld [vmem:[%s5037_s0 + $0x50] sm:$0xff]  ;;  %vm585_vm1 = vcmp.lt.s32.totalorder %v3846_v20, 110  ;;  %vm506_vm2 = vcmp.lt.s32.totalorder %v3846_v20, 111 }
   0x5   :  { %3165 = vrot.lane.b32.xlu1 %v3164_v7, %s3662_s17  ;;  %v3259_v14 = vpack.i.bf16 %v3790_v13, %v3785_v12  ;;  %v3264_v17 = vpack.i.bf16 %v3804_v16, %v3799_v15  ;;  %v3815_v18 = vld [vmem:[%s5038_s2 + $0x4] ss:$8 sps:$4 sm:$0xff]   ;;  %vm427_vm3 = vcmp.lt.s32.totalorder %v3846_v20, 127  ;;  %vm306_vm4 = vcmp.lt.s32.totalorder %v3846_v20, 1 }
   0x6   :  { %2813 = vmatprep.mubr.msk.bf16.mxu0 %vm1054_vm0, %v3815_v18  ;;  %2814 = vmatprep.mubr.msk.bf16.mxu1 %vm1054_vm0, %v3815_v18  ;;  %vm227_vm5 = vcmp.lt.s32.totalorder %v3846_v20, 17  ;;  %vm148_vm6 = vcmp.lt.s32.totalorder %v3846_v20, 18  ;;  %vm69_vm7 = vcmp.lt.s32.totalorder %v3846_v20, 19  ;;  %vm664_vm8 = vcmp.lt.s32.totalorder %v3846_v20, 109 }
   0x8   :  { %3160 = vrot.lane.b32.xlu0 %v3159_v8, %s3662_s17 }
   0x9   :  { %3170 = vrot.lane.b32.xlu1 %v3154_v3, %s3663_s18 }
   0xc   :  { %3175 = vrot.lane.b32.xlu0 %v3159_v8, %s3663_s18 }
   0xd   :  { %3180 = vrot.lane.b32.xlu1 %v3164_v7, %s3663_s18 }
  0x10   :  { %3185 = vrot.lane.b32.xlu0 %v3154_v3, %s3664_s19 }
  0x11   :  { %3190 = vrot.lane.b32.xlu1 %v3159_v8, %s3664_s19 }
  0x14   :  { %3195 = vrot.lane.b32.xlu0 %v3164_v7, %s3664_s19 }
  0x15   :  { %3200 = vrot.lane.b32.xlu1 %v3164_v7, %s3665_s24 }
  0x18   :  { %3205 = vrot.lane.b32.xlu0 %v3154_v3, %s3665_s24 }
  0x19   :  { %3210 = vrot.lane.b32.xlu1 %v3209_v11, %s3665_s24 }
  0x1c   :  { %3215 = vrot.lane.b32.xlu0 %v3164_v7, %s3666_s25 }
  0x1d   :  { %3220 = vrot.lane.b32.xlu1 %v3154_v3, %s3666_s25 }
  0x20   :  { %3225 = vrot.lane.b32.xlu0 %v3209_v11, %s3666_s25 }
  0x21   :  { %3230 = vrot.lane.b32.xlu1 %v3164_v7, %s3667_s26 }
  0x24   :  { %3235 = vrot.lane.b32.xlu0 %v3154_v3, %s3667_s26 }
  0x25   :  { %3240 = vrot.lane.b32.xlu1 %v3209_v11, %s3667_s26 }
  0x28   :  { %3245 = vrot.lane.b32.xlu0 %v3164_v7, %s3668_s9 }
  0x29   :  { %3250 = vrot.lane.b32.xlu1 %v3154_v3, %s3668_s9 }
  0x2c   :  { %3255 = vrot.lane.b32.xlu0 %v3209_v11, %s3668_s9 }
  0x2d   :  { %3260 = vrot.lane.b32.xlu1 %v3259_v14, %s3662_s17 }
  0x30   :  { %3265 = vrot.lane.b32.xlu0 %v3264_v17, %s3662_s17 }
  0x31   :  { %3270 = vrot.lane.b32.xlu1 %v3154_v3, %s3669_s14  ;;  %v3062_v3 = vpack.c.bf16 %v3724_v1, %v3719_v0 }
  0x34   :  { %3275 = vrot.lane.b32.xlu0 %v3159_v8, %s3669_s14 }
  0x35   :  { %3280 = vrot.lane.b32.xlu1 %v3164_v7, %s3669_s14 }
  0x38   :  { %3285 = vrot.lane.b32.xlu0 %v3259_v14, %s3663_s18 }
  0x39   :  { %3290 = vrot.lane.b32.xlu1 %v3264_v17, %s3663_s18 }
  0x3c   :  { %3295 = vrot.lane.b32.xlu0 %v3209_v11, %s3662_s17 }
  0x3d   :  { %3300 = vrot.lane.b32.xlu1 %v3259_v14, %s3664_s19 }
  0x40   :  { %3305 = vrot.lane.b32.xlu0 %v3264_v17, %s3664_s19 }
  0x41   :  { %3310 = vrot.lane.b32.xlu1 %v3209_v11, %s3663_s18 }
  0x44   :  { %3315 = vrot.lane.b32.xlu0 %v3209_v11, %s3664_s19 }
  0x45   :  { %3320 = vrot.lane.b32.xlu1 %v3159_v8, %s3665_s24 }
  0x48   :  { %3325 = vrot.lane.b32.xlu0 %v3259_v14, %s3665_s24 }
  0x49   :  { %3330 = vrot.lane.b32.xlu1 %v3159_v8, %s3666_s25 }
  0x4c   :  { %3335 = vrot.lane.b32.xlu0 %v3259_v14, %s3666_s25 }
  0x4d   :  { %3340 = vrot.lane.b32.xlu1 %v3264_v17, %s3665_s24 }
  0x50   :  { %3345 = vrot.lane.b32.xlu0 %v3159_v8, %s3667_s26 }
  0x51   :  { %3350 = vrot.lane.b32.xlu1 %v3259_v14, %s3667_s26 }
  0x54   :  { %3355 = vrot.lane.b32.xlu0 %v3264_v17, %s3666_s25 }
  0x55   :  { %3360 = vrot.lane.b32.xlu1 %v3159_v8, %s3668_s9 }
  0x58   :  { %3365 = vrot.lane.b32.xlu0 %v3259_v14, %s3668_s9 }
  0x59   :  { %3370 = vrot.lane.b32.xlu1 %v3264_v17, %s3667_s26 }
  0x5c   :  { %3375 = vrot.lane.b32.xlu0 %v3264_v17, %s3668_s9 }
  0x5d   :  { %3380 = vrot.lane.b32.xlu1 %v3259_v14, %s3669_s14 }
  0x60   :  { %3385 = vrot.lane.b32.xlu0 %v3264_v17, %s3669_s14 }
  0x61   :  { %3390 = vrot.lane.b32.xlu1 %v3209_v11, %s3669_s14 }
  0x76   :  { %v3156_v21 = vpop.permute.xlu0 %3155 }
  0x77   :  { %v3848_v22 = vpop.permute.xlu1 %3165  ;;  %v3158_v23 = vunpack.i.h.bf16 %v3156_v21  ;;  %v3157_v24 = vunpack.i.l.bf16 %v3156_v21 }
  0x78   :  { %v3168_v25 = vunpack.i.h.bf16 %v3848_v22  ;;  %v3167_v26 = vunpack.i.l.bf16 %v3848_v22 }
  0x7a   :  { %v3853_v27 = vpop.permute.xlu0 %3160  ;;  %v594_v31 = vsel %vm585_vm1, %v3167_v26, %v3157_v24  ;;  %v595_v32 = vsel %vm585_vm1, %v3168_v25, %v3158_v23 }
  0x7b   :  { %v3163_v28 = vunpack.i.h.bf16 %v3853_v27  ;;  %v3162_v29 = vunpack.i.l.bf16 %v3853_v27  ;;  %v3171_v30 = vpop.permute.xlu1 %3170  ;;  %v3079_v42 = vpack.c.bf16 %v595_v32, %v594_v31  ;;  %v3061_v31 = vpack.c.bf16 %v3736_v4, %v3729_v2 }
  0x7c   :  { %v3173_v33 = vunpack.i.h.bf16 %v3171_v30  ;;  %v3172_v34 = vunpack.i.l.bf16 %v3171_v30 }
  0x7d   :  { %v592_v35 = vsel %vm585_vm1, %v3157_v24, %v3162_v29  ;;  %v593_v36 = vsel %vm585_vm1, %v3158_v23, %v3163_v28 }
  0x7e   :  { %v3873_v37 = vpop.permute.xlu0 %3175  ;;  %v3080_v38 = vpack.c.bf16 %v593_v36, %v592_v35 }
  0x7f   :  { %v3178_v39 = vunpack.i.h.bf16 %v3873_v37  ;;  %v3177_v40 = vunpack.i.l.bf16 %v3873_v37  ;;  %v3878_v41 = vpop.permute.xlu1 %3180 }
  0x80   :  { %v3183_v43 = vunpack.i.h.bf16 %v3878_v41  ;;  %v3182_v44 = vunpack.i.l.bf16 %v3878_v41  ;;  %1058 = vmatprep.subr.bf16.mxu0 %v3080_v38 }
  0x81   :  { %1059 = vmatpush1.bf16.msra.mxu0 %v3079_v42  ;;  %v513_v45 = vsel %vm506_vm2, %v3172_v34, %v3177_v40  ;;  %v514_v46 = vsel %vm506_vm2, %v3173_v33, %v3178_v39 }
  0x82   :  { %v3186_v47 = vpop.permute.xlu0 %3185  ;;  %v3074_v48 = vpack.c.bf16 %v514_v46, %v513_v45  ;;  %v515_v49 = vsel %vm506_vm2, %v3182_v44, %v3172_v34  ;;  %v516_v50 = vsel %vm506_vm2, %v3183_v43, %v3173_v33 }
  0x83   :  { %v3188_v51 = vunpack.i.h.bf16 %v3186_v47  ;;  %v3187_v52 = vunpack.i.l.bf16 %v3186_v47  ;;  %v3898_v53 = vpop.permute.xlu1 %3190  ;;  %v3073_v54 = vpack.c.bf16 %v516_v50, %v515_v49 }
  0x84   :  { %v3193_v55 = vunpack.i.h.bf16 %v3898_v53  ;;  %v3192_v56 = vunpack.i.l.bf16 %v3898_v53  ;;  %1060 = vmatprep.subr.bf16.mxu0 %v3074_v48 }
  0x85   :  { %1061 = vmatpush1.bf16.msra.mxu0 %v3073_v54 }
  0x86   :  { %v3903_v57 = vpop.permute.xlu0 %3195  ;;  %v434_v58 = vsel %vm427_vm3, %v3187_v52, %v3192_v56  ;;  %v435_v59 = vsel %vm427_vm3, %v3188_v51, %v3193_v55 }
  0x87   :  { %v3198_v60 = vunpack.i.h.bf16 %v3903_v57  ;;  %v3197_v61 = vunpack.i.l.bf16 %v3903_v57  ;;  %v3201_v62 = vpop.permute.xlu1 %3200  ;;  %v3068_v63 = vpack.c.bf16 %v435_v59, %v434_v58 }
  0x88   :  { %v3203_v7 = vunpack.i.h.bf16 %v3201_v62  ;;  %v3202_v8 = vunpack.i.l.bf16 %v3201_v62 }
  0x89   :  { %1062 = vmatprep.subr.bf16.mxu0 %v3068_v63  ;;  %v436_v11 = vsel %vm427_vm3, %v3197_v61, %v3187_v52  ;;  %v437_v14 = vsel %vm427_vm3, %v3198_v60, %v3188_v51 }
  0x8a   :  { %v3925_v17 = vpop.permute.xlu0 %3205  ;;  %v3067_v21 = vpack.c.bf16 %v437_v14, %v436_v11 }
  0x8b   :  { %v3208_v0 = vunpack.i.h.bf16 %v3925_v17  ;;  %v3207_v1 = vunpack.i.l.bf16 %v3925_v17  ;;  %v3930_v23 = vpop.permute.xlu1 %3210 }
  0x8c   :  { %v3213_v24 = vunpack.i.h.bf16 %v3930_v23  ;;  %v3212_v30 = vunpack.i.l.bf16 %v3930_v23  ;;  %1063 = vmatpush1.bf16.msra.mxu0 %v3067_v21 }
  0x8d   :  { %1064 = vmatprep.subr.bf16.mxu0 %v3062_v3  ;;  %v315_v32 = vsel %vm306_vm4, %v3202_v8, %v3207_v1  ;;  %v316_v33 = vsel %vm306_vm4, %v3203_v7, %v3208_v0 }
  0x8e   :  { %v3216_v34 = vpop.permute.xlu0 %3215  ;;  %v3056_v35 = vpack.c.bf16 %v316_v33, %v315_v32  ;;  %v317_v2 = vsel %vm306_vm4, %v3212_v30, %v3202_v8  ;;  %v318_v4 = vsel %vm306_vm4, %v3213_v24, %v3203_v7 }
  0x8f   :  { %v3218_v36 = vunpack.i.h.bf16 %v3216_v34  ;;  %v3217_v38 = vunpack.i.l.bf16 %v3216_v34  ;;  %v3945_v42 = vpop.permute.xlu1 %3220  ;;  %v3055_v48 = vpack.c.bf16 %v318_v4, %v317_v2 }
  0x90   :  { %v3223_v45 = vunpack.i.h.bf16 %v3945_v42  ;;  %v3222_v46 = vunpack.i.l.bf16 %v3945_v42  ;;  %1065 = vmatpush1.bf16.msra.mxu0 %v3061_v31 }
  0x91   :  { %1066 = vmatprep.subr.bf16.mxu0 %v3056_v35 }
  0x92   :  { %v3957_v47 = vpop.permute.xlu0 %3225  ;;  %v236_v49 = vsel %vm227_vm5, %v3217_v38, %v3222_v46  ;;  %v237_v50 = vsel %vm227_vm5, %v3218_v36, %v3223_v45 }
  0x93   :  { %v3228_v51 = vunpack.i.h.bf16 %v3957_v47  ;;  %v3227_v52 = vunpack.i.l.bf16 %v3957_v47  ;;  %v3231_v54 = vpop.permute.xlu1 %3230  ;;  %v3050_v58 = vpack.c.bf16 %v237_v50, %v236_v49 }
  0x94   :  { %1067 = vmatpush1.bf16.msra.mxu0 %v3055_v48  ;;  %v3233_v59 = vunpack.i.h.bf16 %v3231_v54  ;;  %v3232_v62 = vunpack.i.l.bf16 %v3231_v54 }
  0x95   :  { %1068 = vmatprep.subr.bf16.mxu0 %v3050_v58  ;;  %v238_v63 = vsel %vm227_vm5, %v3227_v52, %v3217_v38  ;;  %v239_v3 = vsel %vm227_vm5, %v3228_v51, %v3218_v36 }
  0x96   :  { %v3977_v7 = vpop.permute.xlu0 %3235  ;;  %v3049_v8 = vpack.c.bf16 %v239_v3, %v238_v63 }
  0x97   :  { %v3238_v11 = vunpack.i.h.bf16 %v3977_v7  ;;  %v3237_v14 = vunpack.i.l.bf16 %v3977_v7  ;;  %v3982_v21 = vpop.permute.xlu1 %3240 }
  0x98   :  { %v5047_v31 = vunpack.i.h.bf16 %v3982_v21  ;;  %v5048_v32 = vunpack.i.l.bf16 %v3982_v21  ;;  %1069 = vmatpush1.bf16.msra.mxu0 %v3049_v8 }
  0x99   :  { %v157_v33 = vsel %vm148_vm6, %v3232_v62, %v3237_v14  ;;  %v158_v34 = vsel %vm148_vm6, %v3233_v59, %v3238_v11 }
  0x9a   :  { %v3246_v35 = vpop.permute.xlu0 %3245  ;;  %v3044_v36 = vpack.c.bf16 %v158_v34, %v157_v33  ;;  %v159_v38 = vsel %vm148_vm6, %v5048_v32, %v3232_v62  ;;  %v160_v2 = vsel %vm148_vm6, %v5047_v31, %v3233_v59 }
  0x9b   :  { %v3248_v4 = vunpack.i.h.bf16 %v3246_v35  ;;  %v3247_v48 = vunpack.i.l.bf16 %v3246_v35  ;;  %v4002_v49 = vpop.permute.xlu1 %3250  ;;  %v3043_v50 = vpack.c.bf16 %v160_v2, %v159_v38 }
  0x9c   :  { %v5049_v54 = vunpack.i.h.bf16 %v4002_v49  ;;  %v5053_v58 = vunpack.i.l.bf16 %v4002_v49  ;;  %1070 = vmatprep.subr.bf16.mxu0 %v3044_v36 }
  0x9d   :  { %1071 = vmatpush1.bf16.msra.mxu0 %v3043_v50 }
  0x9e   :  { %v4007_v63 = vpop.permute.xlu0 %3255  ;;  %v78_v59 = vsel %vm69_vm7, %v3247_v48, %v5053_v58  ;;  %v79_v62 = vsel %vm69_vm7, %v3248_v4, %v5049_v54 }
  0x9f   :  { %v5051_v3 = vunpack.i.h.bf16 %v4007_v63  ;;  %v5052_v8 = vunpack.i.l.bf16 %v4007_v63  ;;  %v3261_v33 = vpop.permute.xlu1 %3260  ;;  %v3038_v34 = vpack.c.bf16 %v79_v62, %v78_v59 }
  0xa0   :  { %v3263_v35 = vunpack.i.h.bf16 %v3261_v33  ;;  %v3262_v36 = vunpack.i.l.bf16 %v3261_v33 }
  0xa1   :  { %1072 = vmatprep.subr.bf16.mxu0 %v3038_v34  ;;  %v80_v38 = vsel %vm69_vm7, %v5052_v8, %v3247_v48  ;;  %v81_v2 = vsel %vm69_vm7, %v5051_v3, %v3248_v4 }
  0xa2   :  { %v3266_v50 = vpop.permute.xlu0 %3265  ;;  %v3037_v19 = vpack.c.bf16 %v81_v2, %v80_v38  ;;  %v590_v59 = vsel %vm585_vm1, %v3162_v29, %v3262_v36  ;;  %v591_v48 = vsel %vm585_vm1, %v3163_v28, %v3263_v35 }
  0xa3   :  { %v3268_v31 = vunpack.i.h.bf16 %v3266_v50  ;;  %v3267_v32 = vunpack.i.l.bf16 %v3266_v50  ;;  %v3271_v54 = vpop.permute.xlu1 %3270  ;;  %v3081_v28 = vpack.c.bf16 %v591_v48, %v590_v59 }
  0xa4   :  { %1073 = vmatpush1.bf16.msra.mxu0 %v3037_v19  ;;  %v3273_v62 = vunpack.i.h.bf16 %v3271_v54  ;;  %v3272_v33 = vunpack.i.l.bf16 %v3271_v54 }
  0xa5   :  { %v588_v4 = vsel %vm585_vm1, %v3262_v36, %v3267_v32  ;;  %v589_v34 = vsel %vm585_vm1, %v3263_v35, %v3268_v31 }
  0xa6   :  { %v4039_v38 = vpop.permute.xlu0 %3275  ;;  %v3082_v19 = vpack.c.bf16 %v589_v34, %v588_v4 }
  0xa7   :  { %v5056_v29 = vunpack.i.h.bf16 %v4039_v38  ;;  %v5050_v27 = vunpack.i.l.bf16 %v4039_v38  ;;  %v4044_v2 = vpop.permute.xlu1 %3280 }
  0xa8   :  { %v5054_v54 = vunpack.i.h.bf16 %v4044_v2  ;;  %v5055_v50 = vunpack.i.l.bf16 %v4044_v2  ;;  %1101 = vmatprep.subr.bf16.mxu1 %v3082_v19 }
  0xa9   :  { %1102 = vmatpush1.bf16.msra.mxu1 %v3081_v28  ;;  %v671_v35 = vsel %vm664_vm8, %v3272_v33, %v5050_v27  ;;  %v672_v36 = vsel %vm664_vm8, %v3273_v62, %v5056_v29 }
  0xaa   :  { %v3286_v4 = vpop.permute.xlu0 %3285  ;;  %v3086_v34 = vpack.c.bf16 %v672_v36, %v671_v35  ;;  %v673_v59 = vsel %vm664_vm8, %v5055_v50, %v3272_v33  ;;  %v674_v48 = vsel %vm664_vm8, %v5054_v54, %v3273_v62  ;;  %v4067_v35 = vld [vmem:[%s5038_s2] ss:$8 sps:$4 sm:$0xff]  }
  0xab   :  { %v3288_v19 = vunpack.i.h.bf16 %v3286_v4  ;;  %v3287_v28 = vunpack.i.l.bf16 %v3286_v4  ;;  %v3291_v27 = vpop.permute.xlu1 %3290  ;;  %v3085_v3 = vpack.c.bf16 %v674_v48, %v673_v59 }
  0xac   :  { %v3293_v8 = vunpack.i.h.bf16 %v3291_v27  ;;  %v3292_v58 = vunpack.i.l.bf16 %v3291_v27  ;;  %1088 = vmatprep.subr.bf16.mxu0 %v3086_v34 }
  0xad   :  { %1089 = vmatpush2.bf16.msra.mxu0 %v3085_v3  ;;  %v511_v33 = vsel %vm506_vm2, %v3177_v40, %v3287_v28  ;;  %v512_v62 = vsel %vm506_vm2, %v3178_v39, %v3288_v19 }
  0xae   :  { %v3296_v36 = vpop.permute.xlu0 %3295  ;;  %v509_v27 = vsel %vm506_vm2, %v3287_v28, %v3292_v58  ;;  %v510_v4 = vsel %vm506_vm2, %v3288_v19, %v3293_v8  ;;  %v3075_v34 = vpack.c.bf16 %v512_v62, %v511_v33 }
  0xaf   :  { %v3298_v59 = vunpack.i.h.bf16 %v3296_v36  ;;  %v3297_v3 = vunpack.i.l.bf16 %v3296_v36  ;;  %v3301_v48 = vpop.permute.xlu1 %3300  ;;  %v3076_v54 = vpack.c.bf16 %v510_v4, %v509_v27 }
  0xb0   :  { %v3303_v50 = vunpack.i.h.bf16 %v3301_v48  ;;  %v3302_v29 = vunpack.i.l.bf16 %v3301_v48  ;;  %1091 = vmatmul.mubr.bf16.vlgmr.msra.gmra.mxu0 %v4067_v35 }
  0xb1   :  { %v586_v37 = vsel %vm585_vm1, %v3267_v32, %v3297_v3  ;;  %v587_v39 = vsel %vm585_vm1, %v3268_v31, %v3298_v59  ;;  %1103 = vmatprep.subr.bf16.mxu1 %v3076_v54  ;;  %v596_v40 = vsel %vm585_vm1, %v3297_v3, %v3167_v26  ;;  %v597_v19 = vsel %vm585_vm1, %v3298_v59, %v3168_v25 }
  0xb2   :  { %v3083_v28 = vpack.c.bf16 %v587_v39, %v586_v37  ;;  %1104 = vmatpush1.bf16.msra.mxu1 %v3075_v34  ;;  %v3306_v33 = vpop.permute.xlu0 %3305  ;;  %v3084_v62 = vpack.c.bf16 %v597_v19, %v596_v40  ;;  %v432_v31 = vsel %vm427_vm3, %v3192_v56, %v3302_v29  ;;  %v433_v32 = vsel %vm427_vm3, %v3193_v55, %v3303_v50 }
  0xb3   :  { %v3308_v26 = vunpack.i.h.bf16 %v3306_v33  ;;  %v3307_v54 = vunpack.i.l.bf16 %v3306_v33  ;;  %v3311_v22 = vpop.permute.xlu1 %3310  ;;  %2815 = vmatprep.mubr.msk.bf16.mxu0 %vm1054_vm0, %v3815_v18  ;;  %v3069_v53 = vpack.c.bf16 %v433_v32, %v432_v31  ;;  %v3064_v55 = vpack.c.bf16 %v3790_v13, %v3785_v12 }
  0xb4   :  { %v3313_v25 = vunpack.i.h.bf16 %v3311_v22  ;;  %v3312_v36 = vunpack.i.l.bf16 %v3311_v22  ;;  %1144 = vmatprep.subr.bf16.mxu0 %v3084_v62  ;;  %v3063_v39 = vpack.c.bf16 %v3746_v6, %v3741_v5  ;;  %v3066_v31 = vpack.c.bf16 %v3768_v10, %v3763_v9 }
  0xb5   :  { %1145 = vmatpush1.bf16.msra.mxu0 %v3083_v28  ;;  %v430_v27 = vsel %vm427_vm3, %v3302_v29, %v3307_v54  ;;  %v431_v56 = vsel %vm427_vm3, %v3303_v50, %v3308_v26 }
  0xb6   :  { %v507_v4 = vsel %vm506_vm2, %v3292_v58, %v3312_v36  ;;  %v508_v18 = vsel %vm506_vm2, %v3293_v8, %v3313_v25  ;;  %v3316_v34 = vpop.permute.xlu0 %3315  ;;  %v3070_v59 = vpack.c.bf16 %v431_v56, %v430_v27  ;;  %v517_v29 = vsel %vm506_vm2, %v3312_v36, %v3182_v44 }
  0xb7   :  { %v3077_v3 = vpack.c.bf16 %v508_v18, %v507_v4  ;;  %v3318_v48 = vunpack.i.h.bf16 %v3316_v34  ;;  %v3317_v50 = vunpack.i.l.bf16 %v3316_v34  ;;  %v3321_v37 = vpop.permute.xlu1 %3320  ;;  %v518_v12 = vsel %vm506_vm2, %v3313_v25, %v3183_v43 }
  0xb8   :  { %v3323_v13 = vunpack.i.h.bf16 %v3321_v37  ;;  %v3322_v58 = vunpack.i.l.bf16 %v3321_v37  ;;  %1105 = vmatprep.subr.bf16.mxu1 %v3070_v59  ;;  %v3078_v8 = vpack.c.bf16 %v518_v12, %v517_v29  ;;  %v3065_v27 = vpack.c.bf16 %v3804_v16, %v3799_v15 }
  0xb9   :  { %v428_v40 = vsel %vm427_vm3, %v3307_v54, %v3317_v50  ;;  %v429_v44 = vsel %vm427_vm3, %v3308_v26, %v3318_v48  ;;  %1106 = vmatpush1.bf16.msra.mxu1 %v3069_v53  ;;  %v438_v41 = vsel %vm427_vm3, %v3317_v50, %v3197_v61  ;;  %v439_v43 = vsel %vm427_vm3, %v3318_v48, %v3198_v60 }
  0xba   :  { %1146 = vmatprep.subr.bf16.mxu0 %v3078_v8  ;;  %v3326_v19 = vpop.permute.xlu0 %3325  ;;  %1107 = vmatprep.subr.bf16.mxu1 %v3064_v55  ;;  %v3072_v5 = vpack.c.bf16 %v439_v43, %v438_v41  ;;  %v3071_v6 = vpack.c.bf16 %v429_v44, %v428_v40  ;;  %v313_v57 = vsel %vm306_vm4, %v3207_v1, %v3322_v58 }
  0xbb   :  { %1147 = vmatpush1.bf16.msra.mxu0 %v3077_v3  ;;  %v3328_v28 = vunpack.i.h.bf16 %v3326_v19  ;;  %v3327_v33 = vunpack.i.l.bf16 %v3326_v19  ;;  %v3331_v62 = vpop.permute.xlu1 %3330  ;;  %v314_v60 = vsel %vm306_vm4, %v3208_v0, %v3323_v13 }
  0xbc   :  { %v3333_v32 = vunpack.i.h.bf16 %v3331_v62  ;;  %v3332_v26 = vunpack.i.l.bf16 %v3331_v62  ;;  %1148 = vmatprep.subr.bf16.mxu0 %v3072_v5  ;;  %v3057_v36 = vpack.c.bf16 %v314_v60, %v313_v57  ;;  %v5074_v62 = vunpack.i.l.bf16 %v4002_v49 }
  0xbd   :  { %1108 = vmatpush1.bf16.msra.mxu1 %v3063_v39  ;;  %v311_v61 = vsel %vm306_vm4, %v3322_v58, %v3327_v33  ;;  %v312_v9 = vsel %vm306_vm4, %v3323_v13, %v3328_v28 }
  0xbe   :  { %v3336_v10 = vpop.permute.xlu0 %3335  ;;  %v3058_v54 = vpack.c.bf16 %v312_v9, %v311_v61  ;;  %v234_v22 = vsel %vm227_vm5, %v3222_v46, %v3332_v26  ;;  %v235_v17 = vsel %vm227_vm5, %v3223_v45, %v3333_v32 }
  0xbf   :  { %1149 = vmatpush1.bf16.msra.mxu0 %v3071_v6  ;;  %v3338_v0 = vunpack.i.h.bf16 %v3336_v10  ;;  %v3337_v1 = vunpack.i.l.bf16 %v3336_v10  ;;  %v3341_v25 = vpop.permute.xlu1 %3340  ;;  %v3051_v45 = vpack.c.bf16 %v235_v17, %v234_v22 }
  0xc0   :  { %v3343_v56 = vunpack.i.h.bf16 %v3341_v25  ;;  %v3342_v53 = vunpack.i.l.bf16 %v3341_v25  ;;  %1109 = vmatprep.subr.bf16.mxu1 %v3058_v54  ;;  %1150 = vmatprep.subr.bf16.mxu0 %v3066_v31 }
  0xc1   :  { %1110 = vmatpush1.bf16.msra.mxu1 %v3057_v36  ;;  %v232_v46 = vsel %vm227_vm5, %v3332_v26, %v3337_v1  ;;  %v233_v42 = vsel %vm227_vm5, %v3333_v32, %v3338_v0  ;;  %v5075_v32 = vunpack.i.h.bf16 %v4002_v49 }
  0xc2   :  { %v310_v55 = vsel %vm306_vm4, %v3328_v28, %v3343_v56  ;;  %v309_v4 = vsel %vm306_vm4, %v3327_v33, %v3342_v53  ;;  %v3346_v18 = vpop.permute.xlu0 %3345  ;;  %v3052_v15 = vpack.c.bf16 %v233_v42, %v232_v46  ;;  %v307_v16 = vsel %vm306_vm4, %v3342_v53, %v3212_v30 }
  0xc3   :  { %v3059_v34 = vpack.c.bf16 %v310_v55, %v309_v4  ;;  %1151 = vmatpush1.bf16.msra.mxu0 %v3065_v27  ;;  %v3348_v59 = vunpack.i.h.bf16 %v3346_v18  ;;  %v3347_v29 = vunpack.i.l.bf16 %v3346_v18  ;;  %v3351_v3 = vpop.permute.xlu1 %3350  ;;  %v308_v48 = vsel %vm306_vm4, %v3343_v56, %v3213_v24 }
  0xc4   :  { %v3353_v50 = vunpack.i.h.bf16 %v3351_v3  ;;  %v3352_v37 = vunpack.i.l.bf16 %v3351_v3  ;;  %1111 = vmatprep.subr.bf16.mxu1 %v3052_v15  ;;  %v3060_v12 = vpack.c.bf16 %v308_v48, %v307_v16  ;;  %v5077_v53 = vunpack.i.h.bf16 %v3982_v21 }
  0xc5   :  { %1112 = vmatpush1.bf16.msra.mxu1 %v3051_v45  ;;  %v155_v30 = vsel %vm148_vm6, %v3237_v14, %v3347_v29  ;;  %v156_v13 = vsel %vm148_vm6, %v3238_v11, %v3348_v59  ;;  %v5078_v15 = vunpack.i.l.bf16 %v4007_v63 }
  0xc6   :  { %1152 = vmatprep.subr.bf16.mxu0 %v3060_v12  ;;  %v3356_v23 = vpop.permute.xlu0 %3355  ;;  %v153_v24 = vsel %vm148_vm6, %v3347_v29, %v3352_v37  ;;  %v154_v58 = vsel %vm148_vm6, %v3348_v59, %v3353_v50  ;;  %v3045_v8 = vpack.c.bf16 %v156_v13, %v155_v30  ;;  %v5080_v13 = vunpack.i.l.bf16 %v4039_v38 }
  0xc7   :  { %1153 = vmatpush1.bf16.msra.mxu0 %v3059_v34  ;;  %v3358_v39 = vunpack.i.h.bf16 %v3356_v23  ;;  %v3357_v40 = vunpack.i.l.bf16 %v3356_v23  ;;  %v3361_v44 = vpop.permute.xlu1 %3360  ;;  %v3046_v41 = vpack.c.bf16 %v154_v58, %v153_v24 }
  0xc8   :  { %v3363_v14 = vunpack.i.h.bf16 %v3361_v44  ;;  %v3362_v43 = vunpack.i.l.bf16 %v3361_v44 }
  0xc9   :  { %v230_v7 = vsel %vm227_vm5, %v3337_v1, %v3357_v40  ;;  %v231_v11 = vsel %vm227_vm5, %v3338_v0, %v3358_v39  ;;  %1113 = vmatprep.subr.bf16.mxu1 %v3046_v41  ;;  %v228_v19 = vsel %vm227_vm5, %v3357_v40, %v3227_v52  ;;  %v229_v5 = vsel %vm227_vm5, %v3358_v39, %v3228_v51 }
  0xca   :  { %v3053_v6 = vpack.c.bf16 %v231_v11, %v230_v7  ;;  %1114 = vmatpush1.bf16.msra.mxu1 %v3045_v8  ;;  %v3366_v28 = vpop.permute.xlu0 %3365  ;;  %v3054_v33 = vpack.c.bf16 %v229_v5, %v228_v19  ;;  %v76_v31 = vsel %vm69_vm7, %v5074_v62, %v3362_v43  ;;  %v77_v26 = vsel %vm69_vm7, %v5075_v32, %v3363_v14 }
  0xcb   :  { %v3368_v52 = vunpack.i.h.bf16 %v3366_v28  ;;  %v3367_v57 = vunpack.i.l.bf16 %v3366_v28  ;;  %v3371_v47 = vpop.permute.xlu1 %3370  ;;  %v3039_v10 = vpack.c.bf16 %v77_v26, %v76_v31  ;;  %v5076_v0 = vunpack.i.l.bf16 %v3982_v21  ;;  %v42_v31 = vld [vmem:[%s5039_s1] sm:$0x3f] }
  0xcc   :  { %v3373_v60 = vunpack.i.h.bf16 %v3371_v47  ;;  %v3372_v61 = vunpack.i.l.bf16 %v3371_v47  ;;  %1154 = vmatprep.subr.bf16.mxu0 %v3054_v33  ;;  %v5079_v21 = vunpack.i.h.bf16 %v4007_v63  ;;  %v5081_v63 = vunpack.i.h.bf16 %v4039_v38 }
  0xcd   :  { %1155 = vmatpush1.bf16.msra.mxu0 %v3053_v6  ;;  %v74_v51 = vsel %vm69_vm7, %v3362_v43, %v3367_v57  ;;  %v75_v9 = vsel %vm69_vm7, %v3363_v14, %v3368_v52  ;;  %v5082_v41 = vunpack.i.l.bf16 %v4044_v2  ;;  %v5083_v43 = vunpack.i.h.bf16 %v4044_v2 }
  0xce   :  { %v151_v49 = vsel %vm148_vm6, %v3352_v37, %v3372_v61  ;;  %v152_v54 = vsel %vm148_vm6, %v3353_v50, %v3373_v60  ;;  %v3376_v22 = vpop.permute.xlu0 %3375  ;;  %v3040_v17 = vpack.c.bf16 %v75_v9, %v74_v51  ;;  %v149_v1 = vsel %vm148_vm6, %v3372_v61, %v5076_v0 }
  0xcf   :  { %v3047_v25 = vpack.c.bf16 %v152_v54, %v151_v49  ;;  %v3378_v36 = vunpack.i.h.bf16 %v3376_v22  ;;  %v3377_v27 = vunpack.i.l.bf16 %v3376_v22  ;;  %v3381_v56 = vpop.permute.xlu1 %3380  ;;  %v150_v46 = vsel %vm148_vm6, %v3373_v60, %v5077_v53 }
  0xd0   :  { %v3383_v42 = vunpack.i.h.bf16 %v3381_v56  ;;  %v3382_v45 = vunpack.i.l.bf16 %v3381_v56  ;;  %1115 = vmatprep.subr.bf16.mxu1 %v3040_v17  ;;  %v3048_v55 = vpack.c.bf16 %v150_v46, %v149_v1  ;;  %v3670_v5 = vmov 0  }
  0xd1   :  { %v72_v4 = vsel %vm69_vm7, %v3367_v57, %v3377_v27  ;;  %v73_v18 = vsel %vm69_vm7, %v3368_v52, %v3378_v36  ;;  %1116 = vmatpush1.bf16.msra.mxu1 %v3039_v10  ;;  %v70_v16 = vsel %vm69_vm7, %v3377_v27, %v5078_v15  ;;  %v71_v34 = vsel %vm69_vm7, %v3378_v36, %v5079_v21 }
  0xd2   :  { %1156 = vmatprep.subr.bf16.mxu0 %v3048_v55  ;;  %v3386_v59 = vpop.permute.xlu0 %3385  ;;  %v3042_v29 = vpack.c.bf16 %v71_v34, %v70_v16  ;;  %v3041_v3 = vpack.c.bf16 %v73_v18, %v72_v4  ;;  %v669_v23 = vsel %vm664_vm8, %v5080_v13, %v3382_v45  ;;  %v670_v24 = vsel %vm664_vm8, %v5081_v63, %v3383_v42 }
  0xd3   :  { %1157 = vmatpush1.bf16.msra.mxu0 %v3047_v25  ;;  %v3388_v48 = vunpack.i.h.bf16 %v3386_v59  ;;  %v3387_v50 = vunpack.i.l.bf16 %v3386_v59  ;;  %v3391_v37 = vpop.permute.xlu1 %3390  ;;  %v3087_v11 = vpack.c.bf16 %v670_v24, %v669_v23  ;;  %3394 = vset.pattern.permute.xlu1 %v3670_v5  ;;  %v5084_v6 = vlaneseq  ;;  %v1298_v24 = vld [vmem:[%s5040_s4] sm:$0xff] }
  0xd4   :  { %v3393_v12 = vunpack.i.h.bf16 %v3391_v37  ;;  %v3392_v30 = vunpack.i.l.bf16 %v3391_v37  ;;  %1158 = vmatprep.subr.bf16.mxu0 %v3042_v29  ;;  %3395 = vset.pattern.permute.xlu0 %v3670_v5 }
  0xd5   :  { %v667_v58 = vsel %vm664_vm8, %v3382_v45, %v3387_v50  ;;  %v668_v8 = vsel %vm664_vm8, %v3383_v42, %v3388_v48  ;;  %v1189_v28 = vshrl.u32 %v5084_v6, 7 }
  0xd6   :  { %v666_v39 = vsel %vm664_vm8, %v3388_v48, %v3393_v12  ;;  %v665_v40 = vsel %vm664_vm8, %v3387_v50, %v3392_v30  ;;  %v3088_v44 = vpack.c.bf16 %v668_v8, %v667_v58  ;;  %v675_v38 = vsel %vm664_vm8, %v3392_v30, %v5082_v41  ;;  %v1338_v58 = vld [vmem:[%s5041_s5] sm:$0xff]  ;;  %v1339_v8 = vld [vmem:[%s5041_s5 + $0x8] sm:$0xff] }
  0xd7   :  { %v3089_v14 = vpack.c.bf16 %v666_v39, %v665_v40  ;;  %1159 = vmatpush1.bf16.msra.mxu0 %v3041_v3  ;;  %v676_v7 = vsel %vm664_vm8, %v3393_v12, %v5083_v43  ;;  %v1190_v2 = vsub.s32 0, %v1189_v28  ;;  %v1194_v62 = vsub.s32 1, %v1189_v28 }
  0xd8   :  { %1131 = vmatprep.subr.bf16.mxu1 %v3088_v44  ;;  %v3090_v19 = vpack.c.bf16 %v676_v7, %v675_v38  ;;  %v1198_v57 = vsub.s32 2, %v1189_v28  ;;  %v1202_v60 = vsub.s32 3, %v1189_v28  ;;  %v1210_v22 = vsub.s32 5, %v1189_v28 }
  0xd9   :  { %1132 = vmatpush2.bf16.msra.mxu1 %v3087_v11  ;;  %v4266_v26 = vrot.slane %v42_v31, %v1190_v2  ;;  %v4268_v52 = vrot.slane %v42_v31, %v1194_v62 }
  0xda   :  { %1174 = vmatprep.subr.bf16.mxu0 %v3090_v19  ;;  %v4274_v9 = vrot.slane %v42_v31, %v1198_v57  ;;  %v4278_v54 = vrot.slane %v42_v31, %v1202_v60  ;;  %v4286_v45 = vrot.slane %v42_v31, %v1210_v22 }
  0xdb   :  { %1175 = vmatpush2.bf16.msra.mxu0 %v3089_v14 }
  0xdc   :  { %1134 = vmatmul.mubr.bf16.vlgmr.msra.gmra.mxu1 %v4067_v35 }
  0xde   :  { %1177 = vmatmul.mubr.bf16.vlgmr.msra.gmra.mxu0 %v4067_v35  ;;  %v1206_v35 = vsub.s32 4, %v1189_v28 }
  0xe0   :  { %v4276_v49 = vrot.slane %v42_v31, %v1206_v35 }
 0x170   :  { %v1092_v33 = vpop.f32.mrf.mxu0 }
 0x171   :  { %v1218_v61 = vmul.f32 %v4266_v26, %v1092_v33 }
 0x172   :  { %v1094_v32 = vpop.f32.mrf.mxu0 }
 0x173   :  { %v1219_v51 = vmul.f32 %v4268_v52, %v1094_v32 }
 0x174   :  { %v4270_v47 = vpop.f32.mrf.mxu0 }
 0x175   :  { %v1230_v0 = vadd.f32 %v1219_v51, %v1218_v61  ;;  %v1224_v1 = vmul.f32 %v4266_v26, %v4270_v47 }
 0x176   :  { %v1098_v10 = vpop.f32.mrf.mxu0 }
 0x177   :  { %v1225_v25 = vmul.f32 %v4268_v52, %v1098_v10 }
 0x179   :  { %v1237_v18 = vadd.f32 %v1225_v25, %v1224_v1 }
 0x19c   :  { %v1135_v17 = vpop.f32.mrf.mxu1 }
 0x19d   :  { %v1220_v36 = vmul.f32 %v4274_v9, %v1135_v17 }
 0x19e   :  { %v1178_v27 = vpop.f32.mrf.mxu0  ;;  %v1137_v56 = vpop.f32.mrf.mxu1 }
 0x19f   :  { %v1231_v53 = vadd.f32 %v1230_v0, %v1220_v36  ;;  %v1222_v46 = vmul.f32 %v4276_v49, %v1178_v27  ;;  %v1221_v42 = vmul.f32 %v4278_v54, %v1137_v56 }
 0x1a0   :  { %v1180_v55 = vpop.f32.mrf.mxu0  ;;  %v1139_v4 = vpop.f32.mrf.mxu1 }
 0x1a1   :  { %v1232_v15 = vadd.f32 %v1231_v53, %v1221_v42  ;;  %v1226_v16 = vmul.f32 %v4274_v9, %v1139_v4  ;;  %v1223_v59 = vmul.f32 %v4286_v45, %v1180_v55 }
 0x1a2   :  { %v1182_v21 = vpop.f32.mrf.mxu0  ;;  %v1141_v34 = vpop.f32.mrf.mxu1 }
 0x1a3   :  { %v1238_v29 = vadd.f32 %v1237_v18, %v1226_v16  ;;  %v1227_v3 = vmul.f32 %v4278_v54, %v1141_v34  ;;  %v1233_v48 = vadd.f32 %v1232_v15, %v1222_v46  ;;  %v1228_v37 = vmul.f32 %v4276_v49, %v1182_v21 }
 0x1a4   :  { %v1184_v50 = vpop.f32.mrf.mxu0 }
 0x1a5   :  { %v1239_v12 = vadd.f32 %v1238_v29, %v1227_v3  ;;  %v1234_v30 = vadd.f32 %v1233_v48, %v1223_v59  ;;  %v1229_v13 = vmul.f32 %v4286_v45, %v1184_v50 }
 0x1a7   :  { %1235 = vadd.xlane.f32.xlu0 %v1234_v30  ;;  %v1240_v23 = vadd.f32 %v1239_v12, %v1228_v37  ;;  %v1299_v30 = vld [vmem:[%s5040_s4 + $0x8] sm:$0xff] }
 0x1a9   :  { %v1241_v63 = vadd.f32 %v1240_v23, %v1229_v13 }
 0x1ab   :  { %1242 = vadd.xlane.f32.xlu1 %v1241_v63 }
 0x1bc   :  { %1302 = vperm.xlu1 %3394, %v1298_v24  }
 0x1c0   :  { %1342 = vperm.xlu1 %3394, %v1338_v58  }
 0x1c4   :  { %1347 = vperm.xlu1 %3394, %v1339_v8  }
 0x230   :  { %v1236_v39 = vpop.xlane.xlu0 %1235 }
 0x231   :  { %v1244_v40 = vmul.f32 0.001953125, %v1236_v39 }
 0x233   :  { %v4302_v44 = vsub.f32 %v1092_v33, %v1244_v40  ;;  %v1247_v41 = vsub.f32 %v1094_v32, %v1244_v40  ;;  %v4304_v38 = vsub.f32 %v1135_v17, %v1244_v40  ;;  %v4306_v14 = vsub.f32 %v1137_v56, %v1244_v40 }
 0x234   :  { %v1243_v43 = vpop.xlane.xlu1 %1242  ;;  %v4308_v7 = vsub.f32 %v1178_v27, %v1244_v40  ;;  %v4315_v28 = vsub.f32 %v1180_v55, %v1244_v40 }
 0x235   :  { %v1245_v11 = vmul.f32 0.001953125, %v1243_v43  ;;  %v1258_v19 = vmul.f32 %v4302_v44, %v4266_v26  ;;  %v1259_v5 = vmul.f32 %v1247_v41, %v4268_v52  ;;  %v1260_v6 = vmul.f32 %v4304_v38, %v4274_v9 }
 0x236   :  { %v1261_v33 = vmul.f32 %v4306_v14, %v4278_v54  ;;  %v1262_v57 = vmul.f32 %v4308_v7, %v4276_v49  ;;  %v1263_v51 = vmul.f32 %v4315_v28, %v4286_v45 }
 0x237   :  { %v1270_v2 = vmul.f32 %v1258_v19, %v1258_v19  ;;  %v1271_v62 = vmul.f32 %v1259_v5, %v1259_v5  ;;  %v1252_v31 = vsub.f32 %v4270_v47, %v1245_v11  ;;  %v1253_v32 = vsub.f32 %v1098_v10, %v1245_v11 }
 0x238   :  { %v1272_v35 = vmul.f32 %v1260_v6, %v1260_v6  ;;  %v1254_v61 = vsub.f32 %v1139_v4, %v1245_v11  ;;  %v1273_v22 = vmul.f32 %v1261_v33, %v1261_v33  ;;  %v4324_v0 = vsub.f32 %v1141_v34, %v1245_v11  ;;  %v1303_v39 = vpop.permute.xlu1 %1302 }
 0x239   :  { %v1282_v60 = vadd.f32 %v1271_v62, %v1270_v2  ;;  %v1256_v1 = vsub.f32 %v1182_v21, %v1245_v11  ;;  %v1264_v25 = vmul.f32 %v1252_v31, %v4266_v26  ;;  %v1265_v36 = vmul.f32 %v1253_v32, %v4268_v52 }
 0x23a   :  { %v1266_v47 = vmul.f32 %v1254_v61, %v4274_v9  ;;  %v1274_v10 = vmul.f32 %v1262_v57, %v1262_v57  ;;  %v1257_v56 = vsub.f32 %v1184_v50, %v1245_v11  ;;  %v1267_v53 = vmul.f32 %v4324_v0, %v4278_v54 }
 0x23b   :  { %v1283_v17 = vadd.f32 %v1282_v60, %v1272_v35  ;;  %v1276_v46 = vmul.f32 %v1264_v25, %v1264_v25  ;;  %v1277_v42 = vmul.f32 %v1265_v36, %v1265_v36  ;;  %v1275_v55 = vmul.f32 %v1263_v51, %v1263_v51 }
 0x23c   :  { %v1268_v18 = vmul.f32 %v1256_v1, %v4276_v49  ;;  %v1278_v15 = vmul.f32 %v1266_v47, %v1266_v47  ;;  %v1269_v34 = vmul.f32 %v1257_v56, %v4286_v45  ;;  %v1279_v59 = vmul.f32 %v1267_v53, %v1267_v53  ;;  %v1343_v6 = vpop.permute.xlu1 %1342 }
 0x23d   :  { %v1284_v27 = vadd.f32 %v1283_v17, %v1273_v22  ;;  %v1289_v16 = vadd.f32 %v1277_v42, %v1276_v46  ;;  %v1311_v43 = vmul.f32 %v1303_v39, %v1247_v41  ;;  %v1310_v19 = vmul.f32 %v1303_v39, %v4302_v44 }
 0x23e   :  { %v1280_v3 = vmul.f32 %v1268_v18, %v1268_v18  ;;  %v1281_v50 = vmul.f32 %v1269_v34, %v1269_v34  ;;  %v1312_v33 = vmul.f32 %v1303_v39, %v4304_v38  ;;  %v1314_v17 = vmul.f32 %v1303_v39, %v4308_v7 }
 0x23f   :  { %v1285_v4 = vadd.f32 %v1284_v27, %v1274_v10  ;;  %v1290_v29 = vadd.f32 %v1289_v16, %v1278_v15  ;;  %v1315_v25 = vmul.f32 %v1303_v39, %v4315_v28  ;;  %v1313_v7 = vmul.f32 %v1303_v39, %v4306_v14 }
 0x240   :  { %v1348_v53 = vpop.permute.xlu1 %1347 }
 0x241   :  { %v1286_v21 = vadd.f32 %v1285_v4, %v1275_v55  ;;  %v1291_v48 = vadd.f32 %v1290_v29, %v1279_v59 }
 0x243   :  { %1287 = vadd.xlane.f32.xlu0 %v1286_v21  ;;  %v1292_v37 = vadd.f32 %v1291_v48, %v1280_v3 }
 0x245   :  { %v1293_v12 = vadd.f32 %v1292_v37, %v1281_v50 }
 0x247   :  { %1294 = vadd.xlane.f32.xlu0 %v1293_v12 }
 0x25d   :  { %1307 = vperm.xlu0 %3395, %v1299_v30  }
 0x2cc   :  { %v1288_v13 = vpop.xlane.xlu0 %1287 }
 0x2cd   :  { %v1296_v23 = vmul.f32 0.001953125, %v1288_v13 }
 0x2cf   :  { %v1322_v63 = vadd.f32 1e-05, %v1296_v23 }
 0x2d0   :  { %v1295_v24 = vpop.xlane.xlu0 %1294 }
 0x2d1   :  { %3642 = vrsqrt.f32 %v1322_v63  ;;  %v1297_v58 = vmul.f32 0.001953125, %v1295_v24 }
 0x2d3   :  { %v1323_v8 = vadd.f32 1e-05, %v1297_v58 }
 0x2d5   :  { %3644 = vrsqrt.f32 %v1323_v8 }
 0x2d8   :  { %v1308_v5 = vpop.permute.xlu0 %1307 }
 0x2d9   :  { %v1316_v62 = vmul.f32 %v1308_v5, %v1252_v31  ;;  %v1317_v57 = vmul.f32 %v1308_v5, %v1253_v32  ;;  %v1318_v22 = vmul.f32 %v1308_v5, %v1254_v61  ;;  %v1320_v47 = vmul.f32 %v1308_v5, %v1256_v1 }
 0x2da   :  { %v1321_v10 = vmul.f32 %v1308_v5, %v1257_v56  ;;  %v1319_v32 = vmul.f32 %v1308_v5, %v4324_v0 }
 0x2de   :  { %v3643_v40 = vpop.eup %3642 }
 0x2df   :  { %v1327_v11 = vmul.f32 %v3643_v40, %v1311_v43  ;;  %v1326_v2 = vmul.f32 %v3643_v40, %v1310_v19  ;;  %v1328_v35 = vmul.f32 %v3643_v40, %v1312_v33  ;;  %v1330_v15 = vmul.f32 %v3643_v40, %v1314_v17 }
 0x2e0   :  { %v1331_v16 = vmul.f32 %v3643_v40, %v1315_v25  ;;  %v1329_v0 = vmul.f32 %v3643_v40, %v1313_v7 }
 0x2e1   :  { %v1351_v60 = vadd.f32 %v1343_v6, %v1327_v11  ;;  %v1350_v44 = vadd.f32 %v1343_v6, %v1326_v2  ;;  %v1352_v46 = vadd.f32 %v1343_v6, %v1328_v35  ;;  %v1354_v12 = vadd.f32 %v1343_v6, %v1330_v15 }
 0x2e2   :  { %v3645_v51 = vpop.eup %3644  ;;  %v1355_v13 = vadd.f32 %v1343_v6, %v1331_v16  ;;  %v1353_v24 = vadd.f32 %v1343_v6, %v1329_v0 }
 0x2e3   :  { %v1332_v36 = vmul.f32 %v3645_v51, %v1316_v62  ;;  %v1333_v41 = vmul.f32 %v3645_v51, %v1317_v57  ;;  %v1334_v27 = vmul.f32 %v3645_v51, %v1318_v22  ;;  %v1363_v38 = vmax.f32 %v1351_v60, 0.0 }
 0x2e4   :  { %v1336_v55 = vmul.f32 %v3645_v51, %v1320_v47  ;;  %v1337_v4 = vmul.f32 %v3645_v51, %v1321_v10  ;;  %v1335_v1 = vmul.f32 %v3645_v51, %v1319_v32  ;;  %v1362_v21 = vmax.f32 %v1350_v44, 0.0  ;;  %v4441_v44 = vld [vmem:[%s5042_s3 + $0x4] ss:$8 sps:$4 sm:$0xff]  }
 0x2e5   :  { %v1356_v42 = vadd.f32 %v1348_v53, %v1332_v36  ;;  %v1357_v31 = vadd.f32 %v1348_v53, %v1333_v41  ;;  %v1358_v61 = vadd.f32 %v1348_v53, %v1334_v27  ;;  %v1364_v34 = vmax.f32 %v1352_v46, 0.0  ;;  %2926 = vmatprep.mubr.msk.bf16.mxu1 %vm1054_vm0, %v4441_v44  ;;  %2927 = vmatprep.mubr.msk.bf16.mxu0 %vm1054_vm0, %v4441_v44 }
 0x2e6   :  { %v4343_v59 = vmul.f32 %v1363_v38, %v4268_v52  ;;  %v1360_v3 = vadd.f32 %v1348_v53, %v1336_v55  ;;  %v1361_v48 = vadd.f32 %v1348_v53, %v1337_v4  ;;  %v1359_v30 = vadd.f32 %v1348_v53, %v1335_v1 }
 0x2e7   :  { %v1368_v18 = vmax.f32 %v1356_v42, 0.0  ;;  %v1369_v28 = vmax.f32 %v1357_v31, 0.0  ;;  %v1370_v56 = vmax.f32 %v1358_v61, 0.0  ;;  %v4357_v23 = vmul.f32 %v1362_v21, %v4266_v26 }
 0x2e8   :  { %v4360_v63 = vmul.f32 %v1364_v34, %v4274_v9  ;;  %v1372_v58 = vmax.f32 %v1360_v3, 0.0  ;;  %v1373_v8 = vmax.f32 %v1361_v48, 0.0  ;;  %v1371_v43 = vmax.f32 %v1359_v30, 0.0 }
 0x2e9   :  { %v4346_v29 = vmul.f32 %v1369_v28, %v4268_v52  ;;  %v4349_v50 = vmul.f32 %v1368_v18, %v4266_v26  ;;  %v4352_v14 = vmul.f32 %v1370_v56, %v4274_v9  ;;  %v1366_v11 = vmax.f32 %v1354_v12, 0.0 }
 0x2ea   :  { %v1367_v19 = vmax.f32 %v1355_v13, 0.0  ;;  %v1365_v5 = vmax.f32 %v1353_v24, 0.0  ;;  %v4374_v6 = vmul.f32 %v1372_v58, %v4276_v49  ;;  %v4377_v33 = vmul.f32 %v1373_v8, %v4286_v45 }
 0x2eb   :  { %v3426_v37 = vpack.i.bf16 %v4346_v29, %v4343_v59  ;;  %v4366_v39 = vpack.i.bf16 %v4352_v14, %v4360_v63  ;;  %v3436_v40 = vpack.i.bf16 %v4349_v50, %v4357_v23  ;;  %v4380_v2 = vmul.f32 %v1371_v43, %v4278_v54 }
 0x2ec   :  { %v4383_v62 = vmul.f32 %v1366_v11, %v4276_v49  ;;  %v4386_v57 = vmul.f32 %v1367_v19, %v4286_v45  ;;  %v4391_v35 = vmul.f32 %v1365_v5, %v4278_v54  ;;  %v3116_v22 = vpack.c.bf16 %v4346_v29, %v4343_v59 }
 0x2ed   :  { %3427 = vrot.lane.b32.xlu0 %v3426_v37, %s3664_s19  ;;  %3397 = vrot.lane.b32.xlu1 %v3426_v37, %s3662_s17  ;;  %v3115_v17 = vpack.c.bf16 %v4349_v50, %v4357_v23 }
 0x2ee   :  { %v3611_v60 = vpack.i.bf16 %v4374_v6, %v4383_v62  ;;  %v3631_v51 = vpack.i.bf16 %v4377_v33, %v4386_v57  ;;  %v3118_v25 = vpack.c.bf16 %v4380_v2, %v4391_v35  ;;  %v3526_v10 = vpack.i.bf16 %v4380_v2, %v4391_v35 }
 0x2f1   :  { %3402 = vrot.lane.b32.xlu1 %v4366_v39, %s3662_s17  ;;  %3437 = vrot.lane.b32.xlu0 %v3436_v40, %s3664_s19 }
 0x2f5   :  { %3447 = vrot.lane.b32.xlu0 %v3426_v37, %s3665_s24  ;;  %3407 = vrot.lane.b32.xlu1 %v3436_v40, %s3662_s17 }
 0x2f9   :  { %3457 = vrot.lane.b32.xlu0 %v3436_v40, %s3666_s25  ;;  %3412 = vrot.lane.b32.xlu1 %v3426_v37, %s3663_s18 }
 0x2fd   :  { %3467 = vrot.lane.b32.xlu0 %v3631_v51, %s3666_s25  ;;  %3417 = vrot.lane.b32.xlu1 %v4366_v39, %s3663_s18 }
 0x301   :  { %3477 = vrot.lane.b32.xlu0 %v3426_v37, %s3667_s26  ;;  %3422 = vrot.lane.b32.xlu1 %v3436_v40, %s3663_s18 }
 0x305   :  { %3487 = vrot.lane.b32.xlu0 %v3436_v40, %s3668_s9  ;;  %3432 = vrot.lane.b32.xlu1 %v4366_v39, %s3664_s19 }
 0x309   :  { %3497 = vrot.lane.b32.xlu0 %v3631_v51, %s3668_s9  ;;  %3442 = vrot.lane.b32.xlu1 %v3436_v40, %s3665_s24 }
 0x30d   :  { %3507 = vrot.lane.b32.xlu0 %v3611_v60, %s3662_s17  ;;  %3452 = vrot.lane.b32.xlu1 %v3631_v51, %s3665_s24 }
 0x311   :  { %3517 = vrot.lane.b32.xlu0 %v4366_v39, %s3669_s14  ;;  %3462 = vrot.lane.b32.xlu1 %v3426_v37, %s3666_s25 }
 0x315   :  { %3527 = vrot.lane.b32.xlu0 %v3526_v10, %s3663_s18  ;;  %3472 = vrot.lane.b32.xlu1 %v3436_v40, %s3667_s26 }
 0x319   :  { %3537 = vrot.lane.b32.xlu0 %v3631_v51, %s3662_s17  ;;  %3482 = vrot.lane.b32.xlu1 %v3631_v51, %s3667_s26 }
 0x31d   :  { %3547 = vrot.lane.b32.xlu0 %v3611_v60, %s3664_s19  ;;  %3492 = vrot.lane.b32.xlu1 %v3426_v37, %s3668_s9 }
 0x321   :  { %3557 = vrot.lane.b32.xlu0 %v3631_v51, %s3664_s19  ;;  %3502 = vrot.lane.b32.xlu1 %v3526_v10, %s3662_s17 }
 0x325   :  { %3567 = vrot.lane.b32.xlu0 %v3526_v10, %s3665_s24  ;;  %3512 = vrot.lane.b32.xlu1 %v3426_v37, %s3669_s14 }
 0x329   :  { %3577 = vrot.lane.b32.xlu0 %v3526_v10, %s3666_s25  ;;  %3522 = vrot.lane.b32.xlu1 %v3436_v40, %s3669_s14 }
 0x32d   :  { %3587 = vrot.lane.b32.xlu0 %v4366_v39, %s3667_s26  ;;  %3532 = vrot.lane.b32.xlu1 %v3611_v60, %s3663_s18 }
 0x331   :  { %3597 = vrot.lane.b32.xlu0 %v3611_v60, %s3666_s25  ;;  %3542 = vrot.lane.b32.xlu1 %v3526_v10, %s3664_s19 }
 0x335   :  { %3607 = vrot.lane.b32.xlu0 %v3526_v10, %s3668_s9  ;;  %3552 = vrot.lane.b32.xlu1 %v3631_v51, %s3663_s18 }
 0x339   :  { %3617 = vrot.lane.b32.xlu0 %v3611_v60, %s3668_s9  ;;  %3562 = vrot.lane.b32.xlu1 %v4366_v39, %s3665_s24 }
 0x33d   :  { %3627 = vrot.lane.b32.xlu0 %v3611_v60, %s3669_s14  ;;  %3572 = vrot.lane.b32.xlu1 %v4366_v39, %s3666_s25 }
 0x341   :  { %3582 = vrot.lane.b32.xlu1 %v3611_v60, %s3665_s24 }
 0x345   :  { %3592 = vrot.lane.b32.xlu1 %v3526_v10, %s3667_s26 }
 0x349   :  { %3602 = vrot.lane.b32.xlu1 %v4366_v39, %s3668_s9 }
 0x34d   :  { %3612 = vrot.lane.b32.xlu1 %v3611_v60, %s3667_s26 }
 0x351   :  { %3622 = vrot.lane.b32.xlu1 %v3526_v10, %s3669_s14 }
 0x355   :  { %3632 = vrot.lane.b32.xlu1 %v3631_v51, %s3669_s14 }
 0x35f   :  { %v3428_v27 = vpop.permute.xlu0 %3427  ;;  %v3398_v53 = vpop.permute.xlu1 %3397 }
 0x360   :  { %v3400_v42 = vunpack.i.h.bf16 %v3398_v53  ;;  %v3399_v31 = vunpack.i.l.bf16 %v3398_v53  ;;  %v3430_v60 = vunpack.i.h.bf16 %v3428_v27  ;;  %v3429_v51 = vunpack.i.l.bf16 %v3428_v27 }
 0x363   :  { %v4469_v46 = vpop.permute.xlu1 %3402  ;;  %v4471_v38 = vpop.permute.xlu0 %3437 }
 0x364   :  { %v3405_v32 = vunpack.i.h.bf16 %v4469_v46  ;;  %v3404_v55 = vunpack.i.l.bf16 %v4469_v46  ;;  %v3440_v43 = vunpack.i.h.bf16 %v4471_v38  ;;  %v3439_v11 = vunpack.i.l.bf16 %v4471_v38 }
 0x366   :  { %v1926_v4 = vsel %vm585_vm1, %v3399_v31, %v3404_v55  ;;  %v1927_v61 = vsel %vm585_vm1, %v3400_v42, %v3405_v32  ;;  %v1773_v27 = vsel %vm427_vm3, %v3440_v43, %v3430_v60 }
 0x367   :  { %v4483_v7 = vpop.permute.xlu0 %3447  ;;  %v4485_v18 = vpop.permute.xlu1 %3407  ;;  %v3134_v28 = vpack.c.bf16 %v1927_v61, %v1926_v4  ;;  %v1772_v61 = vsel %vm427_vm3, %v3439_v11, %v3429_v51 }
 0x368   :  { %v3410_v15 = vunpack.i.h.bf16 %v4485_v18  ;;  %v3409_v16 = vunpack.i.l.bf16 %v4485_v18 }
 0x369   :  { %2390 = vmatprep.subr.bf16.mxu1 %v3134_v28 }
 0x36a   :  { %v1929_v1 = vsel %vm585_vm1, %v3410_v15, %v3400_v42  ;;  %v1928_v56 = vsel %vm585_vm1, %v3409_v16, %v3399_v31 }
 0x36b   :  { %v3133_v21 = vpack.c.bf16 %v1929_v1, %v1928_v56  ;;  %v4497_v34 = vpop.permute.xlu0 %3457  ;;  %v3413_v0 = vpop.permute.xlu1 %3412 }
 0x36c   :  { %v3415_v37 = vunpack.i.h.bf16 %v3413_v0  ;;  %v3414_v12 = vunpack.i.l.bf16 %v3413_v0  ;;  %v3121_v0 = vpack.c.bf16 %v1773_v27, %v1772_v61  ;;  %v3459_v47 = vunpack.i.l.bf16 %v4497_v34 }
 0x36d   :  { %2391 = vmatpush1.bf16.msra.mxu1 %v3133_v21 }
 0x36f   :  { %v4499_v3 = vpop.permute.xlu0 %3467  ;;  %v4501_v48 = vpop.permute.xlu1 %3417 }
 0x370   :  { %v3420_v30 = vunpack.i.h.bf16 %v4501_v48  ;;  %v3419_v13 = vunpack.i.l.bf16 %v4501_v48  ;;  %v5059_v61 = vunpack.i.h.bf16 %v4499_v3 }
 0x372   :  { %v1848_v24 = vsel %vm506_vm2, %v3414_v12, %v3419_v13  ;;  %v1849_v58 = vsel %vm506_vm2, %v3415_v37, %v3420_v30 }
 0x373   :  { %v4513_v8 = vpop.permute.xlu0 %3477  ;;  %v4515_v39 = vpop.permute.xlu1 %3422  ;;  %v3128_v40 = vpack.c.bf16 %v1849_v58, %v1848_v24  ;;  %v5069_v58 = vunpack.i.h.bf16 %v4483_v7 }
 0x374   :  { %v3425_v19 = vunpack.i.h.bf16 %v4515_v39  ;;  %v3424_v5 = vunpack.i.l.bf16 %v4515_v39 }
 0x375   :  { %2392 = vmatprep.subr.bf16.mxu1 %v3128_v40  ;;  %v5068_v40 = vunpack.i.l.bf16 %v4483_v7 }
 0x376   :  { %v1850_v10 = vsel %vm506_vm2, %v3424_v5, %v3414_v12  ;;  %v1851_v53 = vsel %vm506_vm2, %v3425_v19, %v3415_v37 }
 0x377   :  { %v3127_v42 = vpack.c.bf16 %v1851_v53, %v1850_v10  ;;  %v4529_v31 = vpop.permute.xlu0 %3487  ;;  %v4531_v4 = vpop.permute.xlu1 %3432 }
 0x378   :  { %v3435_v28 = vunpack.i.h.bf16 %v4531_v4  ;;  %v3434_v1 = vunpack.i.l.bf16 %v4531_v4 }
 0x379   :  { %2393 = vmatpush1.bf16.msra.mxu1 %v3127_v42 }
 0x37a   :  { %v1770_v56 = vsel %vm427_vm3, %v3429_v51, %v3434_v1  ;;  %v1771_v21 = vsel %vm427_vm3, %v3430_v60, %v3435_v28 }
 0x37b   :  { %v4551_v37 = vpop.permute.xlu0 %3497  ;;  %v3443_v12 = vpop.permute.xlu1 %3442  ;;  %v3122_v24 = vpack.c.bf16 %v1771_v21, %v1770_v56  ;;  %v5062_v56 = vunpack.i.l.bf16 %v4499_v3 }
 0x37c   :  { %v3445_v10 = vunpack.i.h.bf16 %v3443_v12  ;;  %v3444_v53 = vunpack.i.l.bf16 %v3443_v12 }
 0x37d   :  { %2394 = vmatprep.subr.bf16.mxu1 %v3122_v24  ;;  %v3460_v24 = vunpack.i.h.bf16 %v4497_v34  ;;  %v1576_v34 = vsel %vm227_vm5, %v5062_v56, %v3459_v47 }
 0x37e   :  { %2395 = vmatpush1.bf16.msra.mxu1 %v3121_v0  ;;  %v1652_v51 = vsel %vm306_vm4, %v3444_v53, %v5068_v40  ;;  %v1653_v60 = vsel %vm306_vm4, %v3445_v10, %v5069_v58 }
 0x37f   :  { %v4563_v42 = vpop.permute.xlu0 %3507  ;;  %v4565_v27 = vpop.permute.xlu1 %3452  ;;  %2396 = vmatprep.subr.bf16.mxu1 %v3116_v22  ;;  %v3110_v12 = vpack.c.bf16 %v1653_v60, %v1652_v51 }
 0x380   :  { %v5057_v21 = vunpack.i.h.bf16 %v4565_v27  ;;  %v5058_v0 = vunpack.i.l.bf16 %v4565_v27  ;;  %v3510_v58 = vunpack.i.h.bf16 %v4563_v42 }
 0x382   :  { %v1654_v41 = vsel %vm306_vm4, %v5058_v0, %v3444_v53  ;;  %v1655_v59 = vsel %vm306_vm4, %v5057_v21, %v3445_v10  ;;  %2397 = vmatpush1.bf16.msra.mxu1 %v3115_v17  ;;  %v1577_v10 = vsel %vm227_vm5, %v5059_v61, %v3460_v24  ;;  %v5061_v21 = vunpack.i.h.bf16 %v4513_v8 }
 0x383   :  { %v3109_v29 = vpack.c.bf16 %v1655_v59, %v1654_v41  ;;  %v4587_v22 = vpop.permute.xlu0 %3517  ;;  %v4589_v51 = vpop.permute.xlu1 %3462  ;;  %2398 = vmatprep.subr.bf16.mxu1 %v3110_v12  ;;  %v3103_v41 = vpack.c.bf16 %v1577_v10, %v1576_v34  ;;  %v5060_v0 = vunpack.i.l.bf16 %v4513_v8 }
 0x384   :  { %v5063_v53 = vunpack.i.h.bf16 %v4589_v51  ;;  %v5064_v50 = vunpack.i.l.bf16 %v4589_v51 }
 0x386   :  { %2399 = vmatpush1.bf16.msra.mxu1 %v3109_v29  ;;  %v1574_v23 = vsel %vm227_vm5, %v3459_v47, %v5064_v50  ;;  %v1575_v17 = vsel %vm227_vm5, %v3460_v24, %v5063_v53 }
 0x387   :  { %v4609_v60 = vpop.permute.xlu0 %3527  ;;  %v3473_v12 = vpop.permute.xlu1 %3472  ;;  %v3104_v59 = vpack.c.bf16 %v1575_v17, %v1574_v23 }
 0x388   :  { %v3475_v29 = vunpack.i.h.bf16 %v3473_v12  ;;  %v3474_v61 = vunpack.i.l.bf16 %v3473_v12 }
 0x389   :  { %2400 = vmatprep.subr.bf16.mxu1 %v3104_v59  ;;  %v5067_v59 = vunpack.i.l.bf16 %v4551_v37 }
 0x38a   :  { %2401 = vmatpush1.bf16.msra.mxu1 %v3103_v41  ;;  %v1496_v47 = vsel %vm148_vm6, %v3474_v61, %v5060_v0  ;;  %v1497_v24 = vsel %vm148_vm6, %v3475_v29, %v5061_v21  ;;  %v5070_v41 = vunpack.i.h.bf16 %v4551_v37 }
 0x38b   :  { %v4621_v34 = vpop.permute.xlu0 %3537  ;;  %v4623_v10 = vpop.permute.xlu1 %3482  ;;  %v3098_v23 = vpack.c.bf16 %v1497_v24, %v1496_v47  ;;  %v3490_v47 = vunpack.i.h.bf16 %v4529_v31  ;;  %v3489_v24 = vunpack.i.l.bf16 %v4529_v31 }
 0x38c   :  { %v5065_v17 = vunpack.i.h.bf16 %v4623_v10  ;;  %v5066_v12 = vunpack.i.l.bf16 %v4623_v10  ;;  %v3540_v46 = vunpack.i.h.bf16 %v4621_v34 }
 0x38d   :  { %2402 = vmatprep.subr.bf16.mxu1 %v3098_v23 }
 0x38e   :  { %v1498_v0 = vsel %vm148_vm6, %v5066_v12, %v3474_v61  ;;  %v1499_v21 = vsel %vm148_vm6, %v5065_v17, %v3475_v29  ;;  %v1420_v61 = vsel %vm69_vm7, %v5067_v59, %v3489_v24  ;;  %v1421_v29 = vsel %vm69_vm7, %v5070_v41, %v3490_v47 }
 0x38f   :  { %v3097_v56 = vpack.c.bf16 %v1499_v21, %v1498_v0  ;;  %v4639_v53 = vpop.permute.xlu1 %3492  ;;  %v4641_v50 = vpop.permute.xlu0 %3547  ;;  %v3091_v12 = vpack.c.bf16 %v1421_v29, %v1420_v61  ;;  %v3509_v41 = vunpack.i.l.bf16 %v4563_v42  ;;  %v5073_v61 = vunpack.i.h.bf16 %v4587_v22 }
 0x390   :  { %v5071_v23 = vunpack.i.h.bf16 %v4639_v53  ;;  %v3494_v36 = vunpack.i.l.bf16 %v4639_v53  ;;  %v1921_v18 = vsel %vm585_vm1, %v3510_v58, %v3540_v46  ;;  %v3550_v48 = vunpack.i.h.bf16 %v4641_v50 }
 0x391   :  { %2403 = vmatpush1.bf16.msra.mxu1 %v3097_v56 }
 0x392   :  { %v1418_v31 = vsel %vm69_vm7, %v3489_v24, %v3494_v36  ;;  %v1419_v21 = vsel %vm69_vm7, %v3490_v47, %v5071_v23  ;;  %v3539_v23 = vunpack.i.l.bf16 %v4621_v34 }
 0x393   :  { %v3503_v0 = vpop.permute.xlu1 %3502  ;;  %v3092_v17 = vpack.c.bf16 %v1419_v21, %v1418_v31  ;;  %v4663_v56 = vpop.permute.xlu0 %3557  ;;  %v5072_v31 = vunpack.i.l.bf16 %v4587_v22 }
 0x394   :  { %v3505_v59 = vunpack.i.h.bf16 %v3503_v0  ;;  %v3504_v40 = vunpack.i.l.bf16 %v3503_v0 }
 0x395   :  { %2404 = vmatprep.subr.bf16.mxu1 %v3092_v17 }
 0x396   :  { %v1925_v24 = vsel %vm585_vm1, %v3405_v32, %v3505_v59  ;;  %v1924_v47 = vsel %vm585_vm1, %v3404_v55, %v3504_v40  ;;  %2405 = vmatpush1.bf16.msra.mxu1 %v3091_v12  ;;  %v1922_v42 = vsel %vm585_vm1, %v3504_v40, %v3509_v41  ;;  %v1923_v17 = vsel %vm585_vm1, %v3505_v59, %v3510_v58 }
 0x397   :  { %v3513_v29 = vpop.permute.xlu1 %3512  ;;  %v3135_v21 = vpack.c.bf16 %v1925_v24, %v1924_v47  ;;  %v3136_v55 = vpack.c.bf16 %v1923_v17, %v1922_v42  ;;  %v4691_v47 = vpop.permute.xlu0 %3567  ;;  %v3530_v42 = vunpack.i.h.bf16 %v4609_v60  ;;  %v3529_v17 = vunpack.i.l.bf16 %v4609_v60 }
 0x398   :  { %v3515_v0 = vunpack.i.h.bf16 %v3513_v29  ;;  %v3514_v32 = vunpack.i.l.bf16 %v3513_v29  ;;  %v3569_v39 = vunpack.i.l.bf16 %v4691_v47 }
 0x399   :  { %2433 = vmatprep.subr.bf16.mxu0 %v3136_v55  ;;  %v1930_v55 = vsel %vm585_vm1, %v3539_v23, %v3409_v16 }
 0x39a   :  { %v2004_v12 = vsel %vm664_vm8, %v3514_v32, %v5072_v31  ;;  %v2005_v40 = vsel %vm664_vm8, %v3515_v0, %v5073_v61  ;;  %2434 = vmatpush1.bf16.msra.mxu0 %v3135_v21 }
 0x39b   :  { %v4689_v59 = vpop.permute.xlu1 %3522  ;;  %v3140_v24 = vpack.c.bf16 %v2005_v40, %v2004_v12  ;;  %v1931_v12 = vsel %vm585_vm1, %v3540_v46, %v3410_v15  ;;  %v1920_v40 = vsel %vm585_vm1, %v3509_v41, %v3539_v23  ;;  %v1847_v41 = vsel %vm506_vm2, %v3420_v30, %v3530_v42  ;;  %v4730_v58 = vpop.permute.xlu0 %3577 }
 0x39c   :  { %v3525_v34 = vunpack.i.h.bf16 %v4689_v59  ;;  %v3524_v29 = vunpack.i.l.bf16 %v4689_v59  ;;  %v3138_v61 = vpack.c.bf16 %v1931_v12, %v1930_v55  ;;  %v3137_v55 = vpack.c.bf16 %v1921_v18, %v1920_v40 }
 0x39d   :  { %2420 = vmatprep.subr.bf16.mxu1 %v3140_v24  ;;  %v3549_v30 = vunpack.i.l.bf16 %v4641_v50 }
 0x39e   :  { %v2006_v21 = vsel %vm664_vm8, %v3524_v29, %v3514_v32  ;;  %v2007_v60 = vsel %vm664_vm8, %v3525_v34, %v3515_v0  ;;  %v4720_v32 = vld [vmem:[%s5042_s3] ss:$8 sps:$4 sm:$0xff]   ;;  %v1846_v0 = vsel %vm506_vm2, %v3419_v13, %v3529_v17 }
 0x39f   :  { %v3139_v24 = vpack.c.bf16 %v2007_v60, %v2006_v21  ;;  %v3533_v16 = vpop.permute.xlu1 %3532  ;;  %v3129_v60 = vpack.c.bf16 %v1847_v41, %v1846_v0  ;;  %v4755_v18 = vpop.permute.xlu0 %3587 }
 0x3a0   :  { %v3535_v31 = vunpack.i.h.bf16 %v3533_v16  ;;  %v3534_v15 = vunpack.i.l.bf16 %v3533_v16 }
 0x3a1   :  { %2421 = vmatpush2.bf16.msra.mxu1 %v3139_v24  ;;  %v3559_v24 = vunpack.i.l.bf16 %v4663_v56 }
 0x3a2   :  { %2476 = vmatprep.subr.bf16.mxu1 %v3138_v61  ;;  %v1844_v23 = vsel %vm506_vm2, %v3529_v17, %v3534_v15  ;;  %v1845_v46 = vsel %vm506_vm2, %v3530_v42, %v3535_v31  ;;  %v3560_v61 = vunpack.i.h.bf16 %v4663_v56 }
 0x3a3   :  { %v3543_v12 = vpop.permute.xlu1 %3542  ;;  %v3130_v21 = vpack.c.bf16 %v1845_v46, %v1844_v23 }
 0x3a4   :  { %v3545_v13 = vunpack.i.h.bf16 %v3543_v12  ;;  %v3544_v16 = vunpack.i.l.bf16 %v3543_v12  ;;  %2423 = vmatmul.mubr.bf16.vlgmr.msra.gmra.mxu1 %v4720_v32  ;;  %v1775_v23 = vsel %vm427_vm3, %v3560_v61, %v3440_v43 }
 0x3a5   :  { %2435 = vmatprep.subr.bf16.mxu0 %v3130_v21  ;;  %2477 = vmatpush1.bf16.msra.mxu1 %v3137_v55 }
 0x3a6   :  { %v1768_v42 = vsel %vm427_vm3, %v3434_v1, %v3544_v16  ;;  %v1769_v17 = vsel %vm427_vm3, %v3435_v28, %v3545_v13  ;;  %2436 = vmatpush1.bf16.msra.mxu0 %v3129_v60  ;;  %v1766_v50 = vsel %vm427_vm3, %v3544_v16, %v3549_v30  ;;  %v1767_v56 = vsel %vm427_vm3, %v3545_v13, %v3550_v48  ;;  %v3598_v13 = vpop.permute.xlu0 %3597 }
 0x3a7   :  { %v3553_v40 = vpop.permute.xlu1 %3552  ;;  %2928 = vmatprep.mubr.msk.bf16.mxu1 %vm1054_vm0, %v4441_v44  ;;  %v3123_v0 = vpack.c.bf16 %v1769_v17, %v1768_v42  ;;  %v3124_v4 = vpack.c.bf16 %v1767_v56, %v1766_v50  ;;  %v1774_v28 = vsel %vm427_vm3, %v3559_v24, %v3439_v11  ;;  %v5085_v16 = vunpack.i.h.bf16 %v4483_v7 }
 0x3a8   :  { %v3555_v1 = vunpack.i.h.bf16 %v3553_v40  ;;  %v3554_v41 = vunpack.i.l.bf16 %v3553_v40  ;;  %v3600_v56 = vunpack.i.h.bf16 %v3598_v13 }
 0x3a9   :  { %2437 = vmatprep.subr.bf16.mxu0 %v3124_v4 }
 0x3aa   :  { %v1842_v46 = vsel %vm506_vm2, %v3534_v15, %v3554_v41  ;;  %v1843_v44 = vsel %vm506_vm2, %v3535_v31, %v3555_v1  ;;  %v1852_v55 = vsel %vm506_vm2, %v3554_v41, %v3424_v5  ;;  %v1853_v11 = vsel %vm506_vm2, %v3555_v1, %v3425_v19  ;;  %2438 = vmatpush1.bf16.msra.mxu0 %v3123_v0 }
 0x3ab   :  { %v3131_v38 = vpack.c.bf16 %v1843_v44, %v1842_v46  ;;  %v3563_v12 = vpop.permute.xlu1 %3562  ;;  %v3132_v43 = vpack.c.bf16 %v1853_v11, %v1852_v55  ;;  %v1764_v15 = vsel %vm427_vm3, %v3549_v30, %v3559_v24  ;;  %v1765_v31 = vsel %vm427_vm3, %v3550_v48, %v3560_v61  ;;  %2439 = vmatprep.subr.bf16.mxu0 %v3118_v25  ;;  %v4820_v11 = vpop.permute.xlu0 %3607 }
 0x3ac   :  { %v3565_v21 = vunpack.i.h.bf16 %v3563_v12  ;;  %v3564_v60 = vunpack.i.l.bf16 %v3563_v12  ;;  %v3570_v5 = vunpack.i.h.bf16 %v4691_v47  ;;  %v3126_v19 = vpack.c.bf16 %v1775_v23, %v1774_v28 }
 0x3ad   :  { %2478 = vmatprep.subr.bf16.mxu1 %v3132_v43  ;;  %v5086_v48 = vunpack.i.l.bf16 %v4483_v7  ;;  %v3125_v24 = vpack.c.bf16 %v1765_v31, %v1764_v15  ;;  %v3580_v47 = vunpack.i.h.bf16 %v4730_v58  ;;  %v3579_v25 = vunpack.i.l.bf16 %v4730_v58 }
 0x3ae   :  { %v1651_v30 = vsel %vm306_vm4, %v5085_v16, %v3565_v21  ;;  %2479 = vmatpush1.bf16.msra.mxu1 %v3131_v38  ;;  %v1648_v2 = vsel %vm306_vm4, %v3564_v60, %v3569_v39  ;;  %v1649_v35 = vsel %vm306_vm4, %v3565_v21, %v3570_v5  ;;  %v5087_v7 = vpack.c.bf16 %v4352_v14, %v4360_v63 }
 0x3af   :  { %v1650_v61 = vsel %vm306_vm4, %v5086_v48, %v3564_v60  ;;  %v3573_v42 = vpop.permute.xlu1 %3572  ;;  %2480 = vmatprep.subr.bf16.mxu1 %v3126_v19  ;;  %v3599_v0 = vunpack.i.l.bf16 %v3598_v13  ;;  %v3112_v1 = vpack.c.bf16 %v1649_v35, %v1648_v2  ;;  %v5088_v41 = vunpack.i.l.bf16 %v4589_v51 }
 0x3b0   :  { %v3111_v17 = vpack.c.bf16 %v1651_v30, %v1650_v61  ;;  %2440 = vmatpush1.bf16.msra.mxu0 %v5087_v7  ;;  %v3575_v40 = vunpack.i.h.bf16 %v3573_v42  ;;  %v3574_v50 = vunpack.i.l.bf16 %v3573_v42  ;;  %v5089_v28 = vunpack.i.h.bf16 %v4589_v51 }
 0x3b1   :  { %v3590_v23 = vunpack.i.h.bf16 %v4755_v18  ;;  %2441 = vmatprep.subr.bf16.mxu0 %v3112_v1  ;;  %v5090_v44 = vpack.c.bf16 %v4377_v33, %v4386_v57  ;;  %v3589_v51 = vunpack.i.l.bf16 %v4755_v18  ;;  %v5091_v15 = vunpack.i.l.bf16 %v4499_v3 }
 0x3b2   :  { %v1572_v4 = vsel %vm227_vm5, %v5088_v41, %v3574_v50  ;;  %v1573_v58 = vsel %vm227_vm5, %v5089_v28, %v3575_v40  ;;  %2481 = vmatpush1.bf16.msra.mxu1 %v3125_v24  ;;  %v1570_v14 = vsel %vm227_vm5, %v3574_v50, %v3579_v25  ;;  %v1571_v63 = vsel %vm227_vm5, %v3575_v40, %v3580_v47 }
 0x3b3   :  { %v3583_v46 = vpop.permute.xlu1 %3582  ;;  %2482 = vmatprep.subr.bf16.mxu1 %v5090_v44  ;;  %v3106_v55 = vpack.c.bf16 %v1571_v63, %v1570_v14  ;;  %v3105_v38 = vpack.c.bf16 %v1573_v58, %v1572_v4  ;;  %v1566_v31 = vsel %vm227_vm5, %v3599_v0, %v5091_v15  ;;  %v5092_v21 = vunpack.i.h.bf16 %v4499_v3 }
 0x3b4   :  { %2442 = vmatpush1.bf16.msra.mxu0 %v3111_v17  ;;  %v3585_v12 = vunpack.i.h.bf16 %v3583_v46  ;;  %v3584_v43 = vunpack.i.l.bf16 %v3583_v46  ;;  %v5093_v60 = vpack.c.bf16 %v4374_v6, %v4383_v62  ;;  %v5094_v19 = vunpack.i.l.bf16 %v4565_v27  ;;  %v3618_v17 = vpop.permute.xlu0 %3617 }
 0x3b5   :  { %2443 = vmatprep.subr.bf16.mxu0 %v3106_v55  ;;  %v1567_v33 = vsel %vm227_vm5, %v3600_v56, %v5092_v21  ;;  %v5095_v3 = vunpack.i.h.bf16 %v4565_v27  ;;  %v5096_v61 = vunpack.i.l.bf16 %v4513_v8  ;;  %v5097_v6 = vunpack.i.h.bf16 %v4513_v8 }
 0x3b6   :  { %v1647_v57 = vsel %vm306_vm4, %v3570_v5, %v3585_v12  ;;  %v1646_v18 = vsel %vm306_vm4, %v3569_v39, %v3584_v43  ;;  %2483 = vmatpush1.bf16.msra.mxu1 %v5093_v60  ;;  %v1644_v13 = vsel %vm306_vm4, %v3584_v43, %v5094_v19  ;;  %v1568_v27 = vsel %vm227_vm5, %v3579_v25, %v3599_v0 }
 0x3b7   :  { %v1645_v16 = vsel %vm306_vm4, %v3585_v12, %v5095_v3  ;;  %v3113_v30 = vpack.c.bf16 %v1647_v57, %v1646_v18  ;;  %v3593_v48 = vpop.permute.xlu1 %3592  ;;  %v1494_v39 = vsel %vm148_vm6, %v5096_v61, %v3589_v51  ;;  %v1495_v62 = vsel %vm148_vm6, %v5097_v6, %v3590_v23 }
 0x3b8   :  { %v3114_v5 = vpack.c.bf16 %v1645_v16, %v1644_v13  ;;  %2444 = vmatpush1.bf16.msra.mxu0 %v3105_v38  ;;  %v3595_v24 = vunpack.i.h.bf16 %v3593_v48  ;;  %v3594_v42 = vunpack.i.l.bf16 %v3593_v48  ;;  %v1569_v2 = vsel %vm227_vm5, %v3580_v47, %v3600_v56  ;;  %v3628_v12 = vpop.permute.xlu0 %3627 }
 0x3b9   :  { %v3108_v35 = vpack.c.bf16 %v1567_v33, %v1566_v31  ;;  %v3099_v40 = vpack.c.bf16 %v1495_v62, %v1494_v39  ;;  %v3107_v41 = vpack.c.bf16 %v1569_v2, %v1568_v27  ;;  %v3609_v25 = vunpack.i.l.bf16 %v4820_v11 }
 0x3ba   :  { %2484 = vmatprep.subr.bf16.mxu1 %v3114_v5  ;;  %v1492_v7 = vsel %vm148_vm6, %v3589_v51, %v3594_v42  ;;  %v1493_v8 = vsel %vm148_vm6, %v3590_v23, %v3595_v24  ;;  %v3610_v47 = vunpack.i.h.bf16 %v4820_v11  ;;  %v3620_v56 = vunpack.i.h.bf16 %v3618_v17 }
 0x3bb   :  { %2485 = vmatpush1.bf16.msra.mxu1 %v3113_v30  ;;  %v3603_v50 = vpop.permute.xlu1 %3602  ;;  %v3100_v1 = vpack.c.bf16 %v1493_v8, %v1492_v7  ;;  %v3619_v28 = vunpack.i.l.bf16 %v3618_v17  ;;  %v5098_v14 = vunpack.i.h.bf16 %v4639_v53  ;;  %v5100_v43 = vunpack.i.h.bf16 %v4551_v37 }
 0x3bc   :  { %2486 = vmatprep.subr.bf16.mxu1 %v3108_v35  ;;  %v3605_v0 = vunpack.i.h.bf16 %v3603_v50  ;;  %v3604_v4 = vunpack.i.l.bf16 %v3603_v50  ;;  %v5101_v33 = vunpack.i.l.bf16 %v4623_v10  ;;  %v5102_v18 = vunpack.i.h.bf16 %v4623_v10 }
 0x3bd   :  { %2445 = vmatprep.subr.bf16.mxu0 %v3100_v1  ;;  %v1411_v15 = vsel %vm69_vm7, %v3620_v56, %v5100_v43  ;;  %v3630_v3 = vunpack.i.h.bf16 %v3628_v12  ;;  %v3629_v16 = vunpack.i.l.bf16 %v3628_v12  ;;  %v1412_v5 = vsel %vm69_vm7, %v3609_v25, %v3619_v28 }
 0x3be   :  { %v1416_v58 = vsel %vm69_vm7, %v3494_v36, %v3604_v4  ;;  %v1417_v63 = vsel %vm69_vm7, %v5098_v14, %v3605_v0  ;;  %2446 = vmatpush1.bf16.msra.mxu0 %v3099_v40  ;;  %v1414_v23 = vsel %vm69_vm7, %v3604_v4, %v3609_v25  ;;  %v1415_v55 = vsel %vm69_vm7, %v3605_v0, %v3610_v47 }
 0x3bf   :  { %2487 = vmatpush1.bf16.msra.mxu1 %v3107_v41  ;;  %v3093_v46 = vpack.c.bf16 %v1417_v63, %v1416_v58  ;;  %v3613_v44 = vpop.permute.xlu1 %3612  ;;  %v3094_v38 = vpack.c.bf16 %v1415_v55, %v1414_v23  ;;  %v5099_v36 = vunpack.i.l.bf16 %v4551_v37  ;;  %v1413_v61 = vsel %vm69_vm7, %v3610_v47, %v3620_v56 }
 0x3c0   :  { %v3615_v51 = vunpack.i.h.bf16 %v3613_v44  ;;  %v3614_v11 = vunpack.i.l.bf16 %v3613_v44  ;;  %v5103_v10 = vunpack.i.h.bf16 %v4587_v22  ;;  %v5104_v62 = vunpack.i.l.bf16 %v4587_v22 }
 0x3c1   :  { %v1410_v53 = vsel %vm69_vm7, %v3619_v28, %v5099_v36  ;;  %2447 = vmatprep.subr.bf16.mxu0 %v3094_v38  ;;  %v3095_v7 = vpack.c.bf16 %v1413_v61, %v1412_v5 }
 0x3c2   :  { %v1490_v31 = vsel %vm148_vm6, %v3594_v42, %v3614_v11  ;;  %v1491_v21 = vsel %vm148_vm6, %v3595_v24, %v3615_v51  ;;  %v1488_v57 = vsel %vm148_vm6, %v3614_v11, %v5101_v33  ;;  %v1489_v37 = vsel %vm148_vm6, %v3615_v51, %v5102_v18  ;;  %2448 = vmatpush1.bf16.msra.mxu0 %v3093_v46 }
 0x3c3   :  { %v3101_v60 = vpack.c.bf16 %v1491_v21, %v1490_v31  ;;  %v3623_v19 = vpop.permute.xlu1 %3622  ;;  %v3102_v13 = vpack.c.bf16 %v1489_v37, %v1488_v57  ;;  %v3096_v39 = vpack.c.bf16 %v1411_v15, %v1410_v53 }
 0x3c4   :  { %v3625_v30 = vunpack.i.h.bf16 %v3623_v19  ;;  %v3624_v48 = vunpack.i.l.bf16 %v3623_v19 }
 0x3c5   :  { %2488 = vmatprep.subr.bf16.mxu1 %v3102_v13 }
 0x3c6   :  { %v2003_v6 = vsel %vm664_vm8, %v5103_v10, %v3625_v30  ;;  %v2002_v24 = vsel %vm664_vm8, %v5104_v62, %v3624_v48  ;;  %2489 = vmatpush1.bf16.msra.mxu1 %v3101_v60  ;;  %v2000_v42 = vsel %vm664_vm8, %v3624_v48, %v3629_v16  ;;  %v2001_v27 = vsel %vm664_vm8, %v3625_v30, %v3630_v3  ;;  %v2639_v30 = vld [vmem:[%s5044_s7] sm:$0xff]  ;;  %v2640_v48 = vld [vmem:[%s5044_s7 + $0x8] sm:$0xff] }
 0x3c7   :  { %v3141_v2 = vpack.c.bf16 %v2003_v6, %v2002_v24  ;;  %v3633_v35 = vpop.permute.xlu1 %3632  ;;  %2490 = vmatprep.subr.bf16.mxu1 %v3096_v39  ;;  %v3142_v17 = vpack.c.bf16 %v2001_v27, %v2000_v42 }
 0x3c8   :  { %v3635_v8 = vunpack.i.h.bf16 %v3633_v35  ;;  %v3634_v40 = vunpack.i.l.bf16 %v3633_v35 }
 0x3c9   :  { %2463 = vmatprep.subr.bf16.mxu0 %v3142_v17 }
 0x3ca   :  { %v1999_v22 = vsel %vm664_vm8, %v3630_v3, %v3635_v8  ;;  %v1998_v50 = vsel %vm664_vm8, %v3629_v16, %v3634_v40  ;;  %2464 = vmatpush2.bf16.msra.mxu0 %v3141_v2  ;;  %2491 = vmatpush1.bf16.msra.mxu1 %v3095_v7  ;;  %v2008_v1 = vsel %vm664_vm8, %v3634_v40, %v3524_v29  ;;  %v2599_v16 = vld [vmem:[%s5043_s6] sm:$0xff] }
 0x3cb   :  { %v3143_v41 = vpack.c.bf16 %v1999_v22, %v1998_v50  ;;  %v2009_v25 = vsel %vm664_vm8, %v3635_v8, %v3525_v34 }
 0x3cc   :  { %v3144_v0 = vpack.c.bf16 %v2009_v25, %v2008_v1 }
 0x3cd   :  { %2466 = vmatmul.mubr.bf16.vlgmr.msra.gmra.mxu0 %v4720_v32 }
 0x3ce   :  { %2506 = vmatprep.subr.bf16.mxu1 %v3144_v0 }
 0x3cf   :  { %2507 = vmatpush2.bf16.msra.mxu1 %v3143_v41 }
 0x3d2   :  { %2509 = vmatmul.mubr.bf16.vlgmr.msra.gmra.mxu1 %v4720_v32 }
 0x464   :  { %v2424_v4 = vpop.f32.mrf.mxu1 }
 0x465   :  { %v2519_v28 = vmul.f32 %v2424_v4, %v4266_v26 }
 0x466   :  { %v2426_v47 = vpop.f32.mrf.mxu1 }
 0x467   :  { %v2520_v29 = vmul.f32 %v2426_v47, %v4268_v52 }
 0x468   :  { %v2428_v56 = vpop.f32.mrf.mxu1 }
 0x469   :  { %v2531_v59 = vadd.f32 %v2520_v29, %v2519_v28  ;;  %v2525_v20 = vmul.f32 %v2428_v56, %v4266_v26 }
 0x46a   :  { %v2430_v58 = vpop.f32.mrf.mxu1 }
 0x46b   :  { %v2526_v34 = vmul.f32 %v2430_v58, %v4268_v52 }
 0x46d   :  { %v2538_v55 = vadd.f32 %v2526_v34, %v2525_v20 }
 0x48d   :  { %v2467_v14 = vpop.f32.mrf.mxu0 }
 0x48e   :  { %v2521_v63 = vmul.f32 %v2467_v14, %v4274_v9 }
 0x48f   :  { %v2469_v23 = vpop.f32.mrf.mxu0 }
 0x490   :  { %v2532_v46 = vadd.f32 %v2531_v59, %v2521_v63  ;;  %v2522_v32 = vmul.f32 %v2469_v23, %v4278_v54 }
 0x491   :  { %v2471_v44 = vpop.f32.mrf.mxu0 }
 0x492   :  { %v2533_v51 = vadd.f32 %v2532_v46, %v2522_v32  ;;  %v2527_v11 = vmul.f32 %v2471_v44, %v4274_v9  ;;  %v2510_v38 = vpop.f32.mrf.mxu1 }
 0x493   :  { %v2523_v12 = vmul.f32 %v2510_v38, %v4276_v49  ;;  %v2473_v36 = vpop.f32.mrf.mxu0 }
 0x494   :  { %v2539_v53 = vadd.f32 %v2538_v55, %v2527_v11  ;;  %v2528_v43 = vmul.f32 %v2473_v36, %v4278_v54  ;;  %v2512_v15 = vpop.f32.mrf.mxu1 }
 0x495   :  { %v2534_v31 = vadd.f32 %v2533_v51, %v2523_v12  ;;  %v2524_v21 = vmul.f32 %v2512_v15, %v4286_v45 }
 0x496   :  { %v2540_v33 = vadd.f32 %v2539_v53, %v2528_v43  ;;  %v2514_v57 = vpop.f32.mrf.mxu1 }
 0x497   :  { %v2535_v18 = vadd.f32 %v2534_v31, %v2524_v21  ;;  %v2529_v37 = vmul.f32 %v2514_v57, %v4276_v49 }
 0x498   :  { %v2516_v60 = vpop.f32.mrf.mxu1 }
 0x499   :  { %v2541_v19 = vadd.f32 %v2540_v33, %v2529_v37  ;;  %v2530_v13 = vmul.f32 %v2516_v60, %v4286_v45  ;;  %2536 = vadd.xlane.f32.xlu0 %v2535_v18 }
 0x49b   :  { %v2542_v3 = vadd.f32 %v2541_v19, %v2530_v13 }
 0x49d   :  { %2543 = vadd.xlane.f32.xlu1 %v2542_v3 }
 0x4ae   :  { %2603 = vperm.xlu1 %3394, %v2599_v16  }
 0x4b2   :  { %2643 = vperm.xlu1 %3394, %v2639_v30  }
 0x4b6   :  { %2648 = vperm.xlu1 %3394, %v2640_v48  }
 0x522   :  { %v2537_v5 = vpop.xlane.xlu0 %2536 }
 0x523   :  { %v2545_v61 = vmul.f32 0.001953125, %v2537_v5 }
 0x525   :  { %v2547_v39 = vsub.f32 %v2424_v4, %v2545_v61  ;;  %v2548_v10 = vsub.f32 %v2426_v47, %v2545_v61  ;;  %v2549_v6 = vsub.f32 %v2467_v14, %v2545_v61  ;;  %v2550_v62 = vsub.f32 %v2469_v23, %v2545_v61 }
 0x526   :  { %v2544_v24 = vpop.xlane.xlu1 %2543  ;;  %v2551_v27 = vsub.f32 %v2510_v38, %v2545_v61  ;;  %v2552_v17 = vsub.f32 %v2512_v15, %v2545_v61 }
 0x527   :  { %v2546_v42 = vmul.f32 0.001953125, %v2544_v24  ;;  %v2559_v2 = vmul.f32 %v2547_v39, %v4266_v26  ;;  %v2560_v35 = vmul.f32 %v2548_v10, %v4268_v52  ;;  %v2561_v7 = vmul.f32 %v2549_v6, %v4274_v9 }
 0x528   :  { %v2562_v8 = vmul.f32 %v2550_v62, %v4278_v54  ;;  %v2563_v41 = vmul.f32 %v2551_v27, %v4276_v49  ;;  %v2564_v47 = vmul.f32 %v2552_v17, %v4286_v45 }
 0x529   :  { %v2571_v40 = vmul.f32 %v2559_v2, %v2559_v2  ;;  %v2572_v22 = vmul.f32 %v2560_v35, %v2560_v35  ;;  %v2553_v50 = vsub.f32 %v2428_v56, %v2546_v42  ;;  %v2554_v1 = vsub.f32 %v2430_v58, %v2546_v42 }
 0x52a   :  { %v2573_v25 = vmul.f32 %v2561_v7, %v2561_v7  ;;  %v4951_v4 = vsub.f32 %v2471_v44, %v2546_v42  ;;  %v2574_v28 = vmul.f32 %v2562_v8, %v2562_v8  ;;  %v2556_v29 = vsub.f32 %v2473_v36, %v2546_v42 }
 0x52b   :  { %v2583_v0 = vadd.f32 %v2572_v22, %v2571_v40  ;;  %v2565_v14 = vmul.f32 %v2553_v50, %v4266_v26  ;;  %v2557_v20 = vsub.f32 %v2514_v57, %v2546_v42  ;;  %v2566_v34 = vmul.f32 %v2554_v1, %v4268_v52 }
 0x52c   :  { %v2567_v56 = vmul.f32 %v4951_v4, %v4274_v9  ;;  %v2575_v58 = vmul.f32 %v2563_v41, %v2563_v41  ;;  %v2558_v46 = vsub.f32 %v2516_v60, %v2546_v42  ;;  %v2568_v32 = vmul.f32 %v2556_v29, %v4278_v54  ;;  %v2600_v54 = vld [vmem:[%s5043_s6 + $0x8] sm:$0xff]  ;;  %v2604_v60 = vpop.permute.xlu1 %2603 }
 0x52d   :  { %v2584_v59 = vadd.f32 %v2583_v0, %v2573_v25  ;;  %v2577_v63 = vmul.f32 %v2565_v14, %v2565_v14  ;;  %v2578_v44 = vmul.f32 %v2566_v34, %v2566_v34  ;;  %v2576_v55 = vmul.f32 %v2564_v47, %v2564_v47  ;;  %v3650_v14 = vld [vmem:[%s5037_s0] sm:$0xff] }
 0x52e   :  { %v2569_v11 = vmul.f32 %v2557_v20, %v4276_v49  ;;  %v2579_v38 = vmul.f32 %v2567_v56, %v2567_v56  ;;  %v2570_v36 = vmul.f32 %v2558_v46, %v4286_v45  ;;  %v2580_v52 = vmul.f32 %v2568_v32, %v2568_v32 }
 0x52f   :  { %v2585_v23 = vadd.f32 %v2584_v59, %v2574_v28  ;;  %v2590_v26 = vadd.f32 %v2578_v44, %v2577_v63  ;;  %v2611_v19 = vmul.f32 %v2604_v60, %v2547_v39  ;;  %v2612_v13 = vmul.f32 %v2604_v60, %v2548_v10 }
 0x530   :  { %v2581_v9 = vmul.f32 %v2569_v11, %v2569_v11  ;;  %v2582_v15 = vmul.f32 %v2570_v36, %v2570_v36  ;;  %v2613_v3 = vmul.f32 %v2604_v60, %v2549_v6  ;;  %v2614_v16 = vmul.f32 %v2604_v60, %v2550_v62  ;;  %v2644_v7 = vpop.permute.xlu1 %2643 }
 0x531   :  { %v2586_v51 = vadd.f32 %v2585_v23, %v2575_v58  ;;  %v2591_v53 = vadd.f32 %v2590_v26, %v2579_v38  ;;  %v2615_v5 = vmul.f32 %v2604_v60, %v2551_v27  ;;  %v2616_v61 = vmul.f32 %v2604_v60, %v2552_v17  ;;  %v3654_v58 = vld [vmem:[%s5037_s0 + $0x20] sm:$0xff]  ;;  %v3655_v23 = vld [vmem:[%s5037_s0 + $0x28] sm:$0xff] }
 0x532   :  { %v3659_v60 = vld [vmem:[%s5037_s0 + $0x48] sm:$0xff] }
 0x533   :  { %v2587_v12 = vadd.f32 %v2586_v51, %v2576_v55  ;;  %v2592_v43 = vadd.f32 %v2591_v53, %v2580_v52 }
 0x534   :  { %v2649_v11 = vpop.permute.xlu1 %2648 }
 0x535   :  { %2588 = vadd.xlane.f32.xlu0 %v2587_v12  ;;  %v2593_v31 = vadd.f32 %v2592_v43, %v2581_v9 }
 0x537   :  { %v2594_v21 = vadd.f32 %v2593_v31, %v2582_v15 }
 0x539   :  { %2595 = vadd.xlane.f32.xlu0 %v2594_v21 }
 0x54f   :  { %2608 = vperm.xlu0 %3395, %v2600_v54  }
 0x5be   :  { %v2589_v49 = vpop.xlane.xlu0 %2588 }
 0x5bf   :  { %v2597_v33 = vmul.f32 0.001953125, %v2589_v49  ;;  %v3656_v49 = vld [vmem:[%s5037_s0 + $0x30] sm:$0xff] }
 0x5c1   :  { %v2623_v57 = vadd.f32 1e-05, %v2597_v33 }
 0x5c2   :  { %v2596_v18 = vpop.xlane.xlu0 %2595 }
 0x5c3   :  { %3646 = vrsqrt.f32 %v2623_v57  ;;  %v2598_v45 = vmul.f32 0.001953125, %v2596_v18  ;;  %v3657_v57 = vld [vmem:[%s5037_s0 + $0x38] sm:$0xff] }
 0x5c5   :  { %v2624_v37 = vadd.f32 1e-05, %v2598_v45  ;;  %v3658_v45 = vld [vmem:[%s5037_s0 + $0x40] sm:$0xff] }
 0x5c7   :  { %3648 = vrsqrt.f32 %v2624_v37 }
 0x5ca   :  { %v2609_v30 = vpop.permute.xlu0 %2608 }
 0x5cb   :  { %v2617_v8 = vmul.f32 %v2609_v30, %v2553_v50  ;;  %v2618_v40 = vmul.f32 %v2609_v30, %v2554_v1  ;;  %v2619_v10 = vmul.f32 %v2609_v30, %v4951_v4  ;;  %v2620_v6 = vmul.f32 %v2609_v30, %v2556_v29  ;;  %v3651_v50 = vld [vmem:[%s5037_s0 + $0x8] sm:$0xff]  ;;  %v3652_v4 = vld [vmem:[%s5037_s0 + $0x10] sm:$0xff] }
 0x5cc   :  { %v2621_v27 = vmul.f32 %v2609_v30, %v2557_v20  ;;  %v2622_v17 = vmul.f32 %v2609_v30, %v2558_v46  ;;  %v3653_v20 = vld [vmem:[%s5037_s0 + $0x18] sm:$0xff] }
 0x5d0   :  { %v3647_v48 = vpop.eup %3646 }
 0x5d1   :  { %v2627_v24 = vmul.f32 %v3647_v48, %v2611_v19  ;;  %v2628_v42 = vmul.f32 %v3647_v48, %v2612_v13  ;;  %v2629_v2 = vmul.f32 %v3647_v48, %v2613_v3  ;;  %v2630_v35 = vmul.f32 %v3647_v48, %v2614_v16  ;;  %v3660_v13 = vld [vmem:[%s5037_s0 + $0x50] sm:$0xff]  ;;  %v3661_v16 = vld [vmem:[%s5037_s0 + $0x58] sm:$0xff] }
 0x5d2   :  { %v2631_v22 = vmul.f32 %v3647_v48, %v2615_v5  ;;  %v2632_v41 = vmul.f32 %v3647_v48, %v2616_v61 }
 0x5d3   :  { %v2651_v25 = vadd.f32 %v2644_v7, %v2627_v24  ;;  %v2652_v0 = vadd.f32 %v2644_v7, %v2628_v42  ;;  %v2653_v47 = vadd.f32 %v2644_v7, %v2629_v2  ;;  %v2654_v39 = vadd.f32 %v2644_v7, %v2630_v35 }
 0x5d4   :  { %v2655_v62 = vadd.f32 %v2644_v7, %v2631_v22  ;;  %v2656_v28 = vadd.f32 %v2644_v7, %v2632_v41  ;;  %v3649_v34 = vpop.eup %3648 }
 0x5d5   :  { %v2663_v59 = vadd.f32 %v3650_v14, %v2651_v25  ;;  %v2664_v1 = vadd.f32 %v3651_v50, %v2652_v0  ;;  %v2665_v29 = vadd.f32 %v3652_v4, %v2653_v47  ;;  %v2666_v56 = vadd.f32 %v3653_v20, %v2654_v39 }
 0x5d6   :  { %v2667_v63 = vadd.f32 %v3654_v58, %v2655_v62  ;;  %v2668_v46 = vadd.f32 %v3655_v23, %v2656_v28  ;;  %v2633_v32 = vmul.f32 %v3649_v34, %v2617_v8  ;;  %v2634_v44 = vmul.f32 %v3649_v34, %v2618_v40 }
 0x5d7   :  { %v2635_v55 = vmul.f32 %v3649_v34, %v2619_v10  ;;  %v2636_v51 = vmul.f32 %v3649_v34, %v2620_v6  ;;  %v2637_v38 = vmul.f32 %v3649_v34, %v2621_v27  ;;  %v2638_v26 = vmul.f32 %v3649_v34, %v2622_v17 }
 0x5d8   :  { %v2675_v12 = vmax.f32 %v2663_v59, 0.0  ;;  %v2676_v36 = vmax.f32 %v2664_v1, 0.0  ;;  %v2657_v52 = vadd.f32 %v2649_v11, %v2633_v32  ;;  %v2658_v53 = vadd.f32 %v2649_v11, %v2634_v44 }
 0x5d9   :  { %v2659_v9 = vadd.f32 %v2649_v11, %v2635_v55  ;;  %v2660_v43 = vadd.f32 %v2649_v11, %v2636_v51  ;;  %v2661_v15 = vadd.f32 %v2649_v11, %v2637_v38  ;;  %v2662_v31 = vadd.f32 %v2649_v11, %v2638_v26 }
 0x5da   :  { %v2677_v21 = vmax.f32 %v2665_v29, 0.0  ;;  %v2678_v54 = vmax.f32 %v2666_v56, 0.0  ;;  %2687 = vst [vmem:[%s5045_s8] sm:$0xff] %v2675_v12  ;;  %2688 = vst [vmem:[%s5045_s8 + $0x8] sm:$0xff] %v2676_v36  ;;  %v2669_v33 = vadd.f32 %v3656_v49, %v2657_v52  ;;  %v2670_v18 = vadd.f32 %v3657_v57, %v2658_v53 }
 0x5db   :  { %v2671_v37 = vadd.f32 %v3658_v45, %v2659_v9  ;;  %v2672_v19 = vadd.f32 %v3659_v60, %v2660_v43  ;;  %v2673_v3 = vadd.f32 %v3660_v13, %v2661_v15  ;;  %v2674_v30 = vadd.f32 %v3661_v16, %v2662_v31 }
 0x5dc   :  { %v2679_v48 = vmax.f32 %v2667_v63, 0.0  ;;  %v2680_v5 = vmax.f32 %v2668_v46, 0.0  ;;  %2689 = vst [vmem:[%s5045_s8 + $0x10] sm:$0xff] %v2677_v21  ;;  %2690 = vst [vmem:[%s5045_s8 + $0x18] sm:$0xff] %v2678_v54  ;;  %v2681_v61 = vmax.f32 %v2669_v33, 0.0  ;;  %v2682_v24 = vmax.f32 %v2670_v18, 0.0 }
 0x5dd   :  { %v2683_v42 = vmax.f32 %v2671_v37, 0.0  ;;  %v2684_v2 = vmax.f32 %v2672_v19, 0.0  ;;  %v2685_v35 = vmax.f32 %v2673_v3, 0.0  ;;  %v2686_v7 = vmax.f32 %v2674_v30, 0.0 }
 0x5de   :  { %2691 = vst [vmem:[%s5045_s8 + $0x20] sm:$0xff] %v2679_v48  ;;  %2692 = vst [vmem:[%s5045_s8 + $0x28] sm:$0xff] %v2680_v5 }
 0x5df   :  { %2693 = vst [vmem:[%s5045_s8 + $0x30] sm:$0xff] %v2681_v61  ;;  %2694 = vst [vmem:[%s5045_s8 + $0x38] sm:$0xff] %v2682_v24 }
 0x5e0   :  { %2695 = vst [vmem:[%s5045_s8 + $0x40] sm:$0xff] %v2683_v42  ;;  %2696 = vst [vmem:[%s5045_s8 + $0x48] sm:$0xff] %v2684_v2 }
 0x5e1   :  { %2697 = vst [vmem:[%s5045_s8 + $0x50] sm:$0xff] %v2685_v35  ;;  %2698 = vst [vmem:[%s5045_s8 + $0x58] sm:$0xff] %v2686_v7 }

</bundles_post_ra>
